<compile_context>
chip_gen: v7x
topology: tpu7x:2x2x1
jax: 0.10.0
libtpu: 0.0.40
codegen_flags: <defaults>
</compile_context>

<pallas_src>
import functools
import re

import jax
import jax.numpy as jnp
from jax.experimental import pallas as pl
from jax.experimental.pallas import tpu as pltpu


def _round_up(x, m):
    return ((x + m - 1) // m) * m


def _tpu_generation():
    """Best-effort TPU generation (5, 6, 7, ...) from the device kind string."""
    try:
        kind = jax.devices()[0].device_kind
    except Exception:
        return 0
    m = re.search(r"(\d+)", kind)
    return int(m.group(1)) if m else 0


def _device_config():
    gen = _tpu_generation()
    return dict(
        # v7x: 64 MiB VMEM/TC -> small chunks; v5e/v6e: 128 MiB -> big chunks.
        time_chunk=32 if gen >= 7 else (128 if gen in (5, 6) else 64),
        vmem_limit=(32 if gen >= 7 else (96 if gen in (5, 6) else 32)) * 1024 * 1024,
        # Only v7x has 2 TensorCores per chip -> the "parallel" batch split pays off there.
        split_batch=gen >= 7,
        # bf16-native MXU on v6e/v7x: run the two hoisted matmuls in bf16.
        hoist_bf16=gen >= 6,
    )


def _seqlab_kernel(x_ref, seqlen_ref, wih_ref, whh_ref, b_ref, wfc_ref, bfc_ref,
                   out_ref, h_scr, c_scr, hbuf, gxbuf, *, unroll, hoist_bf16):
    """One (batch-block, time-chunk) grid step of the LSTM + FC forward.

    x_ref      : [Tc, Bb, E]    f32   time-major input chunk
    seqlen_ref : [Bb, 1]        i32
    wih_ref    : [E, 4*Hp]      f32/bf16  (gate order i, f, g, o; lane-aligned per gate)
    whh_ref    : [Hp, 4*Hp]     f32
    b_ref      : [1, 4*Hp]      f32   (b_ih + b_hh merged)
    wfc_ref    : [Hp, Cp]       f32/bf16
    bfc_ref    : [1, Cp]        f32
    out_ref    : [Bb, Tc, Cp]   f32   batch-major output block
    h_scr,c_scr: [Bb, Hp]       f32   recurrent state (persists across time chunks)
    hbuf       : [Tc, Bb, Hp]   f32   per-chunk hidden states
    gxbuf      : [Tc, Bb, 4*Hp] f32   precomputed input projection
    """
    Tc, Bb, E = x_ref.shape
    Hp = whh_ref.shape[0]
    Cp = wfc_ref.shape[1]

    # Re-init recurrent state at the start of each batch-block's time sweep.
    @pl.when(pl.program_id(1) == 0)
    def _init():
        h_scr[...] = jnp.zeros_like(h_scr)
        c_scr[...] = jnp.zeros_like(c_scr)

    # ---- hoisted input projection: one well-shaped MXU matmul per chunk ----
    x2d = x_ref[...].reshape(Tc * Bb, E)
    if hoist_bf16:
        x2d = x2d.astype(jnp.bfloat16)
    gx = jnp.dot(x2d, wih_ref[...], preferred_element_type=jnp.float32) + b_ref[...]
    gxbuf[...] = gx.reshape(Tc, Bb, 4 * Hp)

    # ---- serial recurrence: h/c live in registers, only h_{t-1} @ W_hh per step ----
    def step(t, carry):
        h, c = carry
        gates = gxbuf[t] + jnp.dot(h, whh_ref[...], preferred_element_type=jnp.float32)
        # Hp is a multiple of 128 -> all gate slices are lane-aligned vreg views.
        i_g = jax.nn.sigmoid(gates[:, 0:Hp])
        f_g = jax.nn.sigmoid(gates[:, Hp:2 * Hp])
        g_g = jnp.tanh(gates[:, 2 * Hp:3 * Hp])
        o_g = jax.nn.sigmoid(gates[:, 3 * Hp:4 * Hp])
        c_new = f_g * c + i_g * g_g
        h_new = o_g * jnp.tanh(c_new)
        hbuf[t] = h_new          # off the serial chain
        return (h_new, c_new)

    h_fin, c_fin = jax.lax.fori_loop(0, Tc, step, (h_scr[...], c_scr[...]),
                                     unroll=unroll)
    # Persist state once per chunk for the next "arbitrary" time step.
    h_scr[...] = h_fin
    c_scr[...] = c_fin

    # ---- hoisted mask + FC; emit batch-major so the wrapper needs no transpose ----
    h_bt = pltpu.einshape("tbh->bth", hbuf[...])                 # [Bb, Tc, Hp]
    t0 = pl.program_id(1) * Tc
    t_idx = jax.lax.broadcasted_iota(jnp.int32, (Bb, Tc, 1), 1) + t0
    valid = t_idx < seqlen_ref[...][:, :, None]                  # [Bb, Tc, 1]
    h_bt = jnp.where(valid, h_bt, 0.0)

    h2d = h_bt.reshape(Bb * Tc, Hp)
    if hoist_bf16:
        h2d = h2d.astype(jnp.bfloat16)
    out2d = jnp.dot(h2d, wfc_ref[...], preferred_element_type=jnp.float32) + bfc_ref[...]
    out_ref[...] = out2d.reshape(Bb, Tc, Cp).astype(out_ref.dtype)


def _pad_gate_cols(w, H, Hp):
    """[rows, 4*H] -> [rows, 4*Hp] with each (i,f,g,o) block at a lane-aligned offset."""
    rows = w.shape[0]
    out = jnp.zeros((rows, 4, Hp), w.dtype)
    out = out.at[:, :, :H].set(w.reshape(rows, 4, H))
    return out.reshape(rows, 4 * Hp)


@functools.partial(
    jax.jit,
    static_argnames=("time_chunk", "vmem_limit", "split_batch", "hoist_bf16"))
def _forward_impl(words, seq_len, params, *, time_chunk, vmem_limit, split_batch,
                  hoist_bf16):
    emb = params["embedding"]           # [V, E]
    wih = params["w_ih"]                # [E, 4H]
    whh = params["w_hh"]                # [H, 4H]
    b = params["b"]                     # [1, 4H]
    wfc = params["w_fc"]                # [H, C]
    bfc = params["b_fc"]                # [1, C]

    B, T = words.shape
    E = emb.shape[1]
    H = whh.shape[0]
    C = wfc.shape[1]

    LANE, SUB = 128, 8
    Hp = _round_up(H, LANE)             # lane-aligned gates
    Cp = _round_up(C, LANE)             # lane-dense output
    Bp = _round_up(B, SUB)              # sublane-aligned batch

    # Batch block: split in two only on multi-TensorCore chips (v7x).
    Bb = Bp // 2 if (split_batch and Bp >= 16 and Bp % 16 == 0) else Bp

    # Time chunk: multiple of 8, bounded by T, shrunk until the per-chunk VMEM
    # estimate fits the budget for this chip generation.
    Tc = _round_up(min(time_chunk, _round_up(T, SUB)), SUB)
    mm_bytes = 2 if hoist_bf16 else 4

    def _vmem_bytes(tc):
        x_blk = 2 * tc * Bb * E * 4                      # double-buffered input
        out_blk = 2 * Bb * tc * Cp * 4                   # double-buffered output
        gxb = tc * Bb * 4 * Hp * 4
        hb = tc * Bb * Hp * 4
        w = 2 * ((E * 4 * Hp + Hp * Cp) * mm_bytes + Hp * 4 * Hp * 4
                 + (4 * Hp + Cp) * 4)
        st = 2 * Bb * Hp * 4
        return x_blk + out_blk + gxb + hb + w + st

    while Tc > SUB and _vmem_bytes(Tc) > 0.7 * vmem_limit:
        Tc = max(SUB, _round_up(Tc // 2, SUB))

    T_pad = _round_up(T, Tc)

    # Unroll: recurrence is latency-bound; cap by h/c vreg pressure.
    state_vregs = 2 * max(1, (Bb * Hp * 4) // 4096)
    if Tc <= 16:
        unroll = Tc
    elif state_vregs <= 8:
        unroll = 16
    elif state_vregs <= 16:
        unroll = 8
    else:
        unroll = 4

    # ---- pad weights (zero padding is exact: padded hidden units stay at h=0) ----
    f32 = jnp.float32
    mm_dtype = jnp.bfloat16 if hoist_bf16 else f32
    wih_p = _pad_gate_cols(wih.astype(f32), H, Hp).astype(mm_dtype)              # [E, 4Hp]
    whh_p = jnp.zeros((Hp, 4 * Hp), f32).at[:H, :].set(
        _pad_gate_cols(whh.astype(f32), H, Hp))                                  # [Hp, 4Hp]
    b_p = _pad_gate_cols(b.astype(f32), H, Hp)                                   # [1, 4Hp]
    wfc_p = (jnp.zeros((Hp, Cp), f32).at[:H, :C]
             .set(wfc.astype(f32)).astype(mm_dtype))                             # [Hp, Cp]
    bfc_p = jnp.zeros((1, Cp), f32).at[:, :C].set(bfc.astype(f32))               # [1, Cp]

    # ---- pad inputs; gather embeddings directly in time-major order ----
    words_p = jnp.zeros((Bp, T_pad), jnp.int32).at[:B, :T].set(words.astype(jnp.int32))
    seqlen_p = jnp.zeros((Bp, 1), jnp.int32).at[:B, 0].set(seq_len.astype(jnp.int32))
    x_tbe = jnp.take(emb.astype(f32), words_p.T, axis=0)                          # [T_pad, Bp, E]

    grid = (Bp // Bb, T_pad // Tc)
    kernel = functools.partial(_seqlab_kernel, unroll=unroll, hoist_bf16=hoist_bf16)

    out_btc = pl.pallas_call(
        kernel,
        out_shape=jax.ShapeDtypeStruct((Bp, T_pad, Cp), jnp.float32),
        grid=grid,
        in_specs=[
            pl.BlockSpec((Tc, Bb, E), lambda bi, ti: (ti, bi, 0)),
            pl.BlockSpec((Bb, 1), lambda bi, ti: (bi, 0)),
            pl.BlockSpec((E, 4 * Hp), lambda bi, ti: (0, 0)),
            pl.BlockSpec((Hp, 4 * Hp), lambda bi, ti: (0, 0)),
            pl.BlockSpec((1, 4 * Hp), lambda bi, ti: (0, 0)),
            pl.BlockSpec((Hp, Cp), lambda bi, ti: (0, 0)),
            pl.BlockSpec((1, Cp), lambda bi, ti: (0, 0)),
        ],
        out_specs=pl.BlockSpec((Bb, Tc, Cp), lambda bi, ti: (bi, ti, 0)),
        scratch_shapes=[
            pltpu.VMEM((Bb, Hp), jnp.float32),          # h state
            pltpu.VMEM((Bb, Hp), jnp.float32),          # c state
            pltpu.VMEM((Tc, Bb, Hp), jnp.float32),      # per-chunk hidden states
            pltpu.VMEM((Tc, Bb, 4 * Hp), jnp.float32),  # precomputed input projection
        ],
        compiler_params=pltpu.CompilerParams(
            dimension_semantics=("parallel", "arbitrary"),
            vmem_limit_bytes=vmem_limit,
        ),
    )(x_tbe, seqlen_p, wih_p, whh_p, b_p, wfc_p, bfc_p)

    # Output already batch-major; just slice the padding away.
    return out_btc[:B, :T, :C]


def seq_labeling_forward(words, seq_len, params):
    """words: [B, T] int32, seq_len: [B] int32 -> pred: [B, T, C] float32."""
    cfg = _device_config()
    return _forward_impl(words, seq_len, params, **cfg)


def _reference_forward(words, seq_len, params):
    """Pure-JAX reference matching the PyTorch module's forward semantics."""
    emb, wih, whh, b, wfc, bfc = (params[k] for k in
                                  ("embedding", "w_ih", "w_hh", "b", "w_fc", "b_fc"))
    H = whh.shape[0]
    x = jnp.take(emb, words, axis=0)                    # [B, T, E]
    B, T, _ = x.shape

    def step(carry, x_t):
        h, c = carry
        gates = x_t @ wih + h @ whh + b
        i = jax.nn.sigmoid(gates[:, :H])
        f = jax.nn.sigmoid(gates[:, H:2 * H])
        g = jnp.tanh(gates[:, 2 * H:3 * H])
        o = jax.nn.sigmoid(gates[:, 3 * H:])
        c = f * c + i * g
        h = o * jnp.tanh(c)
        return (h, c), h

    h0 = jnp.zeros((B, H), jnp.float32)
    (_, _), hs = jax.lax.scan(step, (h0, h0), jnp.transpose(x, (1, 0, 2)))
    hs = jnp.transpose(hs, (1, 0, 2))                   # [B, T, H]
    mask = (jnp.arange(T)[None, :] < seq_len[:, None])[:, :, None]
    hs = jnp.where(mask, hs, 0.0)
    return hs @ wfc + bfc


def init_params(key, vocab_size, embed_dim, hidden_size, num_classes):
    k = jax.random.split(key, 6)
    s = 1.0 / jnp.sqrt(hidden_size)
    return {
        "embedding": jax.random.normal(k[0], (vocab_size, embed_dim), jnp.float32),
        "w_ih": jax.random.uniform(k[1], (embed_dim, 4 * hidden_size), jnp.float32, -s, s),
        "w_hh": jax.random.uniform(k[2], (hidden_size, 4 * hidden_size), jnp.float32, -s, s),
        # b_ih + b_hh merged into a single bias
        "b": jax.random.uniform(k[3], (1, 4 * hidden_size), jnp.float32, -s, s),
        "w_fc": jax.random.uniform(k[4], (hidden_size, num_classes), jnp.float32, -s, s),
        "b_fc": jax.random.uniform(k[5], (1, num_classes), jnp.float32, -s, s),
    }
    # TODO(synk): CRF loss / viterbi decode are only used in train_step/evaluate_step,
    # not in forward(); not implemented here.


if __name__ == "__main__":
    VOCAB, E, H, C = 20, 32, 32, 8
    B, T = 2, 8

    key = jax.random.PRNGKey(0)
    pkey, wkey = jax.random.split(key)
    params = init_params(pkey, VOCAB, E, H, C)

    words = jax.random.randint(wkey, (B, T), 0, VOCAB, dtype=jnp.int32)
    seq_len = jnp.array([T, 5], dtype=jnp.int32)

    pred = seq_labeling_forward(words, seq_len, params)
    pred = jax.block_until_ready(pred)

    assert pred.shape == (B, T, C), pred.shape
    assert pred.dtype == jnp.float32

    ref = jax.block_until_ready(_reference_forward(words, seq_len, params))
    tol = 5e-2 if _device_config()["hoist_bf16"] else 2e-3
    max_err = float(jnp.max(jnp.abs(pred - ref)))
    assert jnp.allclose(pred, ref, atol=tol, rtol=tol), max_err

    print("KERNEL_OK")
</pallas_src>

<mosaic_0001>
module attributes {stable_mosaic.version = 11 : i64} {
  func.func @_seqlab_kernel(%arg0: i32, %arg1: i32, %arg2: memref<8x8x32xf32, #tpu.memory_space<vmem>>, %arg3: memref<8x1xi32, #tpu.memory_space<vmem>>, %arg4: memref<32x512xf32, #tpu.memory_space<vmem>>, %arg5: memref<128x512xf32, #tpu.memory_space<vmem>>, %arg6: memref<1x512xf32, #tpu.memory_space<vmem>>, %arg7: memref<128x128xf32, #tpu.memory_space<vmem>>, %arg8: memref<1x128xf32, #tpu.memory_space<vmem>>, %arg9: memref<8x8x128xf32, #tpu.memory_space<vmem>>, %arg10: memref<8x128xf32, #tpu.memory_space<vmem>>, %arg11: memref<8x128xf32, #tpu.memory_space<vmem>>, %arg12: memref<8x8x128xf32, #tpu.memory_space<vmem>>, %arg13: memref<8x8x512xf32, #tpu.memory_space<vmem>>) attributes {dimension_semantics = [#tpu.dimension_semantics<parallel>, #tpu.dimension_semantics<arbitrary>], iteration_bounds = array<i64: 1, 1>, scalar_prefetch = 0 : i64, scratch_operands = 4 : i64, tpu.core_type = #tpu.core_type<tc>, window_params = [{transform_indices = @transform_0, window_bounds = array<i64: 8, 8, 32>}, {transform_indices = @transform_1, window_bounds = array<i64: 8, 1>}, {pipeline_mode = #tpu.pipeline_mode<synchronous>, transform_indices = @transform_2, window_bounds = array<i64: 32, 512>}, {pipeline_mode = #tpu.pipeline_mode<synchronous>, transform_indices = @transform_3, window_bounds = array<i64: 128, 512>}, {pipeline_mode = #tpu.pipeline_mode<synchronous>, transform_indices = @transform_4, window_bounds = array<i64: 1, 512>}, {pipeline_mode = #tpu.pipeline_mode<synchronous>, transform_indices = @transform_5, window_bounds = array<i64: 128, 128>}, {pipeline_mode = #tpu.pipeline_mode<synchronous>, transform_indices = @transform_6, window_bounds = array<i64: 1, 128>}, {transform_indices = @transform_7, window_bounds = array<i64: 8, 8, 128>}]} {
    %c0_i32 = arith.constant 0 : i32
    %0 = arith.cmpi eq, %arg1, %c0_i32 : i32
    %1 = arith.extui %0 : i1 to i32
    %c0_i32_0 = arith.constant 0 : i32
    %2 = arith.cmpi ne, %1, %c0_i32_0 : i32
    scf.if %2 {
      %cst_114 = arith.constant 0.000000e+00 : f32
      %318 = vector.broadcast %cst_114 : f32 to vector<8x128xf32>
      %c0_115 = arith.constant 0 : index
      %c0_116 = arith.constant 0 : index
      %319 = vector.load %arg10[%c0_115, %c0_116] : memref<8x128xf32, #tpu.memory_space<vmem>>, vector<8x128xf32>
      tpu.vector_store %arg10[%c0_115, %c0_116], %318 {strides = array<i32>} : memref<8x128xf32, #tpu.memory_space<vmem>>, vector<8x128xf32>,
      %cst_117 = arith.constant 0.000000e+00 : f32
      %320 = vector.broadcast %cst_117 : f32 to vector<8x128xf32>
      %c0_118 = arith.constant 0 : index
      %c0_119 = arith.constant 0 : index
      %321 = vector.load %arg11[%c0_118, %c0_119] : memref<8x128xf32, #tpu.memory_space<vmem>>, vector<8x128xf32>
      tpu.vector_store %arg11[%c0_118, %c0_119], %320 {strides = array<i32>} : memref<8x128xf32, #tpu.memory_space<vmem>>, vector<8x128xf32>,
    } else {
    }
    %c0 = arith.constant 0 : index
    %c0_1 = arith.constant 0 : index
    %c0_2 = arith.constant 0 : index
    %3 = vector.load %arg2[%c0, %c0_1, %c0_2] : memref<8x8x32xf32, #tpu.memory_space<vmem>>, vector<8x8x32xf32>
    %4 = vector.shape_cast %3 : vector<8x8x32xf32> to vector<64x32xf32>
    %c0_3 = arith.constant 0 : index
    %c0_4 = arith.constant 0 : index
    %5 = vector.load %arg4[%c0_3, %c0_4] : memref<32x512xf32, #tpu.memory_space<vmem>>, vector<32x512xf32>
    %cst = arith.constant dense<0.000000e+00> : vector<64x512xf32>
    %6 = tpu.matmul %4, %5, %cst {dimension_numbers = #tpu.dot_dimension_numbers<[1], [0], [0], [1], [0, 0, 1, 1], [], []>} : vector<64x32xf32>, vector<32x512xf32>, vector<64x512xf32> -> vector<64x512xf32>
    %c0_5 = arith.constant 0 : index
    %c0_6 = arith.constant 0 : index
    %7 = vector.load %arg6[%c0_5, %c0_6] : memref<1x512xf32, #tpu.memory_space<vmem>>, vector<1x512xf32>
    %8 = vector.broadcast %7 : vector<1x512xf32> to vector<64x512xf32>
    %9 = arith.addf %6, %8 : vector<64x512xf32>
    %10 = vector.shape_cast %9 : vector<64x512xf32> to vector<8x8x512xf32>
    %c0_7 = arith.constant 0 : index
    %c0_8 = arith.constant 0 : index
    %c0_9 = arith.constant 0 : index
    %11 = vector.load %arg13[%c0_7, %c0_8, %c0_9] : memref<8x8x512xf32, #tpu.memory_space<vmem>>, vector<8x8x512xf32>
    tpu.vector_store %arg13[%c0_7, %c0_8, %c0_9], %10 {strides = array<i32>} : memref<8x8x512xf32, #tpu.memory_space<vmem>>, vector<8x8x512xf32>,
    %c0_10 = arith.constant 0 : index
    %c0_11 = arith.constant 0 : index
    %12 = vector.load %arg10[%c0_10, %c0_11] : memref<8x128xf32, #tpu.memory_space<vmem>>, vector<8x128xf32>
    %c0_12 = arith.constant 0 : index
    %c0_13 = arith.constant 0 : index
    %13 = vector.load %arg11[%c0_12, %c0_13] : memref<8x128xf32, #tpu.memory_space<vmem>>, vector<8x128xf32>
    %c0_i32_14 = arith.constant 0 : i32
    %14 = arith.index_cast %c0_i32_14 : i32 to index
    %c0_15 = arith.constant 0 : index
    %c0_16 = arith.constant 0 : index
    %15 = vector.load %arg13[%14, %c0_15, %c0_16] : memref<8x8x512xf32, #tpu.memory_space<vmem>>, vector<1x8x512xf32>
    %16 = vector.shape_cast %15 : vector<1x8x512xf32> to vector<8x512xf32>
    %c0_17 = arith.constant 0 : index
    %c0_18 = arith.constant 0 : index
    %17 = vector.load %arg5[%c0_17, %c0_18] : memref<128x512xf32, #tpu.memory_space<vmem>>, vector<128x512xf32>
    %cst_19 = arith.constant dense<0.000000e+00> : vector<8x512xf32>
    %18 = tpu.matmul %12, %17, %cst_19 {dimension_numbers = #tpu.dot_dimension_numbers<[1], [0], [0], [1], [0, 0, 1, 1], [], []>} : vector<8x128xf32>, vector<128x512xf32>, vector<8x512xf32> -> vector<8x512xf32>
    %19 = arith.addf %16, %18 : vector<8x512xf32>
    %20 = vector.extract_strided_slice %19 {offsets = [0, 0], sizes = [8, 128], strides = [1, 1]} : vector<8x512xf32> to vector<8x128xf32>
    %21 = arith.negf %20 : vector<8x128xf32>
    %22 = math.exp %21 : vector<8x128xf32>
    %cst_20 = arith.constant 1.000000e+00 : f32
    %23 = vector.broadcast %cst_20 : f32 to vector<8x128xf32>
    %24 = arith.addf %23, %22 : vector<8x128xf32>
    %25 = arith.divf %23, %24 : vector<8x128xf32>
    %26 = vector.extract_strided_slice %19 {offsets = [0, 128], sizes = [8, 128], strides = [1, 1]} : vector<8x512xf32> to vector<8x128xf32>
    %27 = arith.negf %26 : vector<8x128xf32>
    %28 = math.exp %27 : vector<8x128xf32>
    %cst_21 = arith.constant 1.000000e+00 : f32
    %29 = vector.broadcast %cst_21 : f32 to vector<8x128xf32>
    %30 = arith.addf %29, %28 : vector<8x128xf32>
    %31 = arith.divf %29, %30 : vector<8x128xf32>
    %32 = vector.extract_strided_slice %19 {offsets = [0, 256], sizes = [8, 128], strides = [1, 1]} : vector<8x512xf32> to vector<8x128xf32>
    %33 = math.tanh %32 : vector<8x128xf32>
    %34 = vector.extract_strided_slice %19 {offsets = [0, 384], sizes = [8, 128], strides = [1, 1]} : vector<8x512xf32> to vector<8x128xf32>
    %35 = arith.negf %34 : vector<8x128xf32>
    %36 = math.exp %35 : vector<8x128xf32>
    %cst_22 = arith.constant 1.000000e+00 : f32
    %37 = vector.broadcast %cst_22 : f32 to vector<8x128xf32>
    %38 = arith.addf %37, %36 : vector<8x128xf32>
    %39 = arith.divf %37, %38 : vector<8x128xf32>
    %40 = arith.mulf %31, %13 : vector<8x128xf32>
    %41 = arith.mulf %25, %33 : vector<8x128xf32>
    %42 = arith.addf %40, %41 : vector<8x128xf32>
    %43 = math.tanh %42 : vector<8x128xf32>
    %44 = arith.mulf %39, %43 : vector<8x128xf32>
    %45 = arith.index_cast %c0_i32_14 : i32 to index
    %c0_23 = arith.constant 0 : index
    %c0_24 = arith.constant 0 : index
    %46 = vector.load %arg12[%45, %c0_23, %c0_24] : memref<8x8x128xf32, #tpu.memory_space<vmem>>, vector<1x8x128xf32>
    %47 = vector.shape_cast %46 : vector<1x8x128xf32> to vector<8x128xf32>
    %48 = vector.shape_cast %44 : vector<8x128xf32> to vector<1x8x128xf32>
    tpu.vector_store %arg12[%45, %c0_23, %c0_24], %48 {strides = array<i32>} : memref<8x8x128xf32, #tpu.memory_space<vmem>>, vector<1x8x128xf32>,
    %c1_i32 = arith.constant 1 : i32
    %49 = arith.index_cast %c1_i32 : i32 to index
    %c0_25 = arith.constant 0 : index
    %c0_26 = arith.constant 0 : index
    %50 = vector.load %arg13[%49, %c0_25, %c0_26] : memref<8x8x512xf32, #tpu.memory_space<vmem>>, vector<1x8x512xf32>
    %51 = vector.shape_cast %50 : vector<1x8x512xf32> to vector<8x512xf32>
    %c0_27 = arith.constant 0 : index
    %c0_28 = arith.constant 0 : index
    %52 = vector.load %arg5[%c0_27, %c0_28] : memref<128x512xf32, #tpu.memory_space<vmem>>, vector<128x512xf32>
    %cst_29 = arith.constant dense<0.000000e+00> : vector<8x512xf32>
    %53 = tpu.matmul %44, %52, %cst_29 {dimension_numbers = #tpu.dot_dimension_numbers<[1], [0], [0], [1], [0, 0, 1, 1], [], []>} : vector<8x128xf32>, vector<128x512xf32>, vector<8x512xf32> -> vector<8x512xf32>
    %54 = arith.addf %51, %53 : vector<8x512xf32>
    %55 = vector.extract_strided_slice %54 {offsets = [0, 0], sizes = [8, 128], strides = [1, 1]} : vector<8x512xf32> to vector<8x128xf32>
    %56 = arith.negf %55 : vector<8x128xf32>
    %57 = math.exp %56 : vector<8x128xf32>
    %cst_30 = arith.constant 1.000000e+00 : f32
    %58 = vector.broadcast %cst_30 : f32 to vector<8x128xf32>
    %59 = arith.addf %58, %57 : vector<8x128xf32>
    %60 = arith.divf %58, %59 : vector<8x128xf32>
    %61 = vector.extract_strided_slice %54 {offsets = [0, 128], sizes = [8, 128], strides = [1, 1]} : vector<8x512xf32> to vector<8x128xf32>
    %62 = arith.negf %61 : vector<8x128xf32>
    %63 = math.exp %62 : vector<8x128xf32>
    %cst_31 = arith.constant 1.000000e+00 : f32
    %64 = vector.broadcast %cst_31 : f32 to vector<8x128xf32>
    %65 = arith.addf %64, %63 : vector<8x128xf32>
    %66 = arith.divf %64, %65 : vector<8x128xf32>
    %67 = vector.extract_strided_slice %54 {offsets = [0, 256], sizes = [8, 128], strides = [1, 1]} : vector<8x512xf32> to vector<8x128xf32>
    %68 = math.tanh %67 : vector<8x128xf32>
    %69 = vector.extract_strided_slice %54 {offsets = [0, 384], sizes = [8, 128], strides = [1, 1]} : vector<8x512xf32> to vector<8x128xf32>
    %70 = arith.negf %69 : vector<8x128xf32>
    %71 = math.exp %70 : vector<8x128xf32>
    %cst_32 = arith.constant 1.000000e+00 : f32
    %72 = vector.broadcast %cst_32 : f32 to vector<8x128xf32>
    %73 = arith.addf %72, %71 : vector<8x128xf32>
    %74 = arith.divf %72, %73 : vector<8x128xf32>
    %75 = arith.mulf %66, %42 : vector<8x128xf32>
    %76 = arith.mulf %60, %68 : vector<8x128xf32>
    %77 = arith.addf %75, %76 : vector<8x128xf32>
    %78 = math.tanh %77 : vector<8x128xf32>
    %79 = arith.mulf %74, %78 : vector<8x128xf32>
    %80 = arith.index_cast %c1_i32 : i32 to index
    %c0_33 = arith.constant 0 : index
    %c0_34 = arith.constant 0 : index
    %81 = vector.load %arg12[%80, %c0_33, %c0_34] : memref<8x8x128xf32, #tpu.memory_space<vmem>>, vector<1x8x128xf32>
    %82 = vector.shape_cast %81 : vector<1x8x128xf32> to vector<8x128xf32>
    %83 = vector.shape_cast %79 : vector<8x128xf32> to vector<1x8x128xf32>
    tpu.vector_store %arg12[%80, %c0_33, %c0_34], %83 {strides = array<i32>} : memref<8x8x128xf32, #tpu.memory_space<vmem>>, vector<1x8x128xf32>,
    %c2_i32 = arith.constant 2 : i32
    %84 = arith.index_cast %c2_i32 : i32 to index
    %c0_35 = arith.constant 0 : index
    %c0_36 = arith.constant 0 : index
    %85 = vector.load %arg13[%84, %c0_35, %c0_36] : memref<8x8x512xf32, #tpu.memory_space<vmem>>, vector<1x8x512xf32>
    %86 = vector.shape_cast %85 : vector<1x8x512xf32> to vector<8x512xf32>
    %c0_37 = arith.constant 0 : index
    %c0_38 = arith.constant 0 : index
    %87 = vector.load %arg5[%c0_37, %c0_38] : memref<128x512xf32, #tpu.memory_space<vmem>>, vector<128x512xf32>
    %cst_39 = arith.constant dense<0.000000e+00> : vector<8x512xf32>
    %88 = tpu.matmul %79, %87, %cst_39 {dimension_numbers = #tpu.dot_dimension_numbers<[1], [0], [0], [1], [0, 0, 1, 1], [], []>} : vector<8x128xf32>, vector<128x512xf32>, vector<8x512xf32> -> vector<8x512xf32>
    %89 = arith.addf %86, %88 : vector<8x512xf32>
    %90 = vector.extract_strided_slice %89 {offsets = [0, 0], sizes = [8, 128], strides = [1, 1]} : vector<8x512xf32> to vector<8x128xf32>
    %91 = arith.negf %90 : vector<8x128xf32>
    %92 = math.exp %91 : vector<8x128xf32>
    %cst_40 = arith.constant 1.000000e+00 : f32
    %93 = vector.broadcast %cst_40 : f32 to vector<8x128xf32>
    %94 = arith.addf %93, %92 : vector<8x128xf32>
    %95 = arith.divf %93, %94 : vector<8x128xf32>
    %96 = vector.extract_strided_slice %89 {offsets = [0, 128], sizes = [8, 128], strides = [1, 1]} : vector<8x512xf32> to vector<8x128xf32>
    %97 = arith.negf %96 : vector<8x128xf32>
    %98 = math.exp %97 : vector<8x128xf32>
    %cst_41 = arith.constant 1.000000e+00 : f32
    %99 = vector.broadcast %cst_41 : f32 to vector<8x128xf32>
    %100 = arith.addf %99, %98 : vector<8x128xf32>
    %101 = arith.divf %99, %100 : vector<8x128xf32>
    %102 = vector.extract_strided_slice %89 {offsets = [0, 256], sizes = [8, 128], strides = [1, 1]} : vector<8x512xf32> to vector<8x128xf32>
    %103 = math.tanh %102 : vector<8x128xf32>
    %104 = vector.extract_strided_slice %89 {offsets = [0, 384], sizes = [8, 128], strides = [1, 1]} : vector<8x512xf32> to vector<8x128xf32>
    %105 = arith.negf %104 : vector<8x128xf32>
    %106 = math.exp %105 : vector<8x128xf32>
    %cst_42 = arith.constant 1.000000e+00 : f32
    %107 = vector.broadcast %cst_42 : f32 to vector<8x128xf32>
    %108 = arith.addf %107, %106 : vector<8x128xf32>
    %109 = arith.divf %107, %108 : vector<8x128xf32>
    %110 = arith.mulf %101, %77 : vector<8x128xf32>
    %111 = arith.mulf %95, %103 : vector<8x128xf32>
    %112 = arith.addf %110, %111 : vector<8x128xf32>
    %113 = math.tanh %112 : vector<8x128xf32>
    %114 = arith.mulf %109, %113 : vector<8x128xf32>
    %115 = arith.index_cast %c2_i32 : i32 to index
    %c0_43 = arith.constant 0 : index
    %c0_44 = arith.constant 0 : index
    %116 = vector.load %arg12[%115, %c0_43, %c0_44] : memref<8x8x128xf32, #tpu.memory_space<vmem>>, vector<1x8x128xf32>
    %117 = vector.shape_cast %116 : vector<1x8x128xf32> to vector<8x128xf32>
    %118 = vector.shape_cast %114 : vector<8x128xf32> to vector<1x8x128xf32>
    tpu.vector_store %arg12[%115, %c0_43, %c0_44], %118 {strides = array<i32>} : memref<8x8x128xf32, #tpu.memory_space<vmem>>, vector<1x8x128xf32>,
    %c3_i32 = arith.constant 3 : i32
    %119 = arith.index_cast %c3_i32 : i32 to index
    %c0_45 = arith.constant 0 : index
    %c0_46 = arith.constant 0 : index
    %120 = vector.load %arg13[%119, %c0_45, %c0_46] : memref<8x8x512xf32, #tpu.memory_space<vmem>>, vector<1x8x512xf32>
    %121 = vector.shape_cast %120 : vector<1x8x512xf32> to vector<8x512xf32>
    %c0_47 = arith.constant 0 : index
    %c0_48 = arith.constant 0 : index
    %122 = vector.load %arg5[%c0_47, %c0_48] : memref<128x512xf32, #tpu.memory_space<vmem>>, vector<128x512xf32>
    %cst_49 = arith.constant dense<0.000000e+00> : vector<8x512xf32>
    %123 = tpu.matmul %114, %122, %cst_49 {dimension_numbers = #tpu.dot_dimension_numbers<[1], [0], [0], [1], [0, 0, 1, 1], [], []>} : vector<8x128xf32>, vector<128x512xf32>, vector<8x512xf32> -> vector<8x512xf32>
    %124 = arith.addf %121, %123 : vector<8x512xf32>
    %125 = vector.extract_strided_slice %124 {offsets = [0, 0], sizes = [8, 128], strides = [1, 1]} : vector<8x512xf32> to vector<8x128xf32>
    %126 = arith.negf %125 : vector<8x128xf32>
    %127 = math.exp %126 : vector<8x128xf32>
    %cst_50 = arith.constant 1.000000e+00 : f32
    %128 = vector.broadcast %cst_50 : f32 to vector<8x128xf32>
    %129 = arith.addf %128, %127 : vector<8x128xf32>
    %130 = arith.divf %128, %129 : vector<8x128xf32>
    %131 = vector.extract_strided_slice %124 {offsets = [0, 128], sizes = [8, 128], strides = [1, 1]} : vector<8x512xf32> to vector<8x128xf32>
    %132 = arith.negf %131 : vector<8x128xf32>
    %133 = math.exp %132 : vector<8x128xf32>
    %cst_51 = arith.constant 1.000000e+00 : f32
    %134 = vector.broadcast %cst_51 : f32 to vector<8x128xf32>
    %135 = arith.addf %134, %133 : vector<8x128xf32>
    %136 = arith.divf %134, %135 : vector<8x128xf32>
    %137 = vector.extract_strided_slice %124 {offsets = [0, 256], sizes = [8, 128], strides = [1, 1]} : vector<8x512xf32> to vector<8x128xf32>
    %138 = math.tanh %137 : vector<8x128xf32>
    %139 = vector.extract_strided_slice %124 {offsets = [0, 384], sizes = [8, 128], strides = [1, 1]} : vector<8x512xf32> to vector<8x128xf32>
    %140 = arith.negf %139 : vector<8x128xf32>
    %141 = math.exp %140 : vector<8x128xf32>
    %cst_52 = arith.constant 1.000000e+00 : f32
    %142 = vector.broadcast %cst_52 : f32 to vector<8x128xf32>
    %143 = arith.addf %142, %141 : vector<8x128xf32>
    %144 = arith.divf %142, %143 : vector<8x128xf32>
    %145 = arith.mulf %136, %112 : vector<8x128xf32>
    %146 = arith.mulf %130, %138 : vector<8x128xf32>
    %147 = arith.addf %145, %146 : vector<8x128xf32>
    %148 = math.tanh %147 : vector<8x128xf32>
    %149 = arith.mulf %144, %148 : vector<8x128xf32>
    %150 = arith.index_cast %c3_i32 : i32 to index
    %c0_53 = arith.constant 0 : index
    %c0_54 = arith.constant 0 : index
    %151 = vector.load %arg12[%150, %c0_53, %c0_54] : memref<8x8x128xf32, #tpu.memory_space<vmem>>, vector<1x8x128xf32>
    %152 = vector.shape_cast %151 : vector<1x8x128xf32> to vector<8x128xf32>
    %153 = vector.shape_cast %149 : vector<8x128xf32> to vector<1x8x128xf32>
    tpu.vector_store %arg12[%150, %c0_53, %c0_54], %153 {strides = array<i32>} : memref<8x8x128xf32, #tpu.memory_space<vmem>>, vector<1x8x128xf32>,
    %c4_i32 = arith.constant 4 : i32
    %154 = arith.index_cast %c4_i32 : i32 to index
    %c0_55 = arith.constant 0 : index
    %c0_56 = arith.constant 0 : index
    %155 = vector.load %arg13[%154, %c0_55, %c0_56] : memref<8x8x512xf32, #tpu.memory_space<vmem>>, vector<1x8x512xf32>
    %156 = vector.shape_cast %155 : vector<1x8x512xf32> to vector<8x512xf32>
    %c0_57 = arith.constant 0 : index
    %c0_58 = arith.constant 0 : index
    %157 = vector.load %arg5[%c0_57, %c0_58] : memref<128x512xf32, #tpu.memory_space<vmem>>, vector<128x512xf32>
    %cst_59 = arith.constant dense<0.000000e+00> : vector<8x512xf32>
    %158 = tpu.matmul %149, %157, %cst_59 {dimension_numbers = #tpu.dot_dimension_numbers<[1], [0], [0], [1], [0, 0, 1, 1], [], []>} : vector<8x128xf32>, vector<128x512xf32>, vector<8x512xf32> -> vector<8x512xf32>
    %159 = arith.addf %156, %158 : vector<8x512xf32>
    %160 = vector.extract_strided_slice %159 {offsets = [0, 0], sizes = [8, 128], strides = [1, 1]} : vector<8x512xf32> to vector<8x128xf32>
    %161 = arith.negf %160 : vector<8x128xf32>
    %162 = math.exp %161 : vector<8x128xf32>
    %cst_60 = arith.constant 1.000000e+00 : f32
    %163 = vector.broadcast %cst_60 : f32 to vector<8x128xf32>
    %164 = arith.addf %163, %162 : vector<8x128xf32>
    %165 = arith.divf %163, %164 : vector<8x128xf32>
    %166 = vector.extract_strided_slice %159 {offsets = [0, 128], sizes = [8, 128], strides = [1, 1]} : vector<8x512xf32> to vector<8x128xf32>
    %167 = arith.negf %166 : vector<8x128xf32>
    %168 = math.exp %167 : vector<8x128xf32>
    %cst_61 = arith.constant 1.000000e+00 : f32
    %169 = vector.broadcast %cst_61 : f32 to vector<8x128xf32>
    %170 = arith.addf %169, %168 : vector<8x128xf32>
    %171 = arith.divf %169, %170 : vector<8x128xf32>
    %172 = vector.extract_strided_slice %159 {offsets = [0, 256], sizes = [8, 128], strides = [1, 1]} : vector<8x512xf32> to vector<8x128xf32>
    %173 = math.tanh %172 : vector<8x128xf32>
    %174 = vector.extract_strided_slice %159 {offsets = [0, 384], sizes = [8, 128], strides = [1, 1]} : vector<8x512xf32> to vector<8x128xf32>
    %175 = arith.negf %174 : vector<8x128xf32>
    %176 = math.exp %175 : vector<8x128xf32>
    %cst_62 = arith.constant 1.000000e+00 : f32
    %177 = vector.broadcast %cst_62 : f32 to vector<8x128xf32>
    %178 = arith.addf %177, %176 : vector<8x128xf32>
    %179 = arith.divf %177, %178 : vector<8x128xf32>
    %180 = arith.mulf %171, %147 : vector<8x128xf32>
    %181 = arith.mulf %165, %173 : vector<8x128xf32>
    %182 = arith.addf %180, %181 : vector<8x128xf32>
    %183 = math.tanh %182 : vector<8x128xf32>
    %184 = arith.mulf %179, %183 : vector<8x128xf32>
    %185 = arith.index_cast %c4_i32 : i32 to index
    %c0_63 = arith.constant 0 : index
    %c0_64 = arith.constant 0 : index
    %186 = vector.load %arg12[%185, %c0_63, %c0_64] : memref<8x8x128xf32, #tpu.memory_space<vmem>>, vector<1x8x128xf32>
    %187 = vector.shape_cast %186 : vector<1x8x128xf32> to vector<8x128xf32>
    %188 = vector.shape_cast %184 : vector<8x128xf32> to vector<1x8x128xf32>
    tpu.vector_store %arg12[%185, %c0_63, %c0_64], %188 {strides = array<i32>} : memref<8x8x128xf32, #tpu.memory_space<vmem>>, vector<1x8x128xf32>,
    %c5_i32 = arith.constant 5 : i32
    %189 = arith.index_cast %c5_i32 : i32 to index
    %c0_65 = arith.constant 0 : index
    %c0_66 = arith.constant 0 : index
    %190 = vector.load %arg13[%189, %c0_65, %c0_66] : memref<8x8x512xf32, #tpu.memory_space<vmem>>, vector<1x8x512xf32>
    %191 = vector.shape_cast %190 : vector<1x8x512xf32> to vector<8x512xf32>
    %c0_67 = arith.constant 0 : index
    %c0_68 = arith.constant 0 : index
    %192 = vector.load %arg5[%c0_67, %c0_68] : memref<128x512xf32, #tpu.memory_space<vmem>>, vector<128x512xf32>
    %cst_69 = arith.constant dense<0.000000e+00> : vector<8x512xf32>
    %193 = tpu.matmul %184, %192, %cst_69 {dimension_numbers = #tpu.dot_dimension_numbers<[1], [0], [0], [1], [0, 0, 1, 1], [], []>} : vector<8x128xf32>, vector<128x512xf32>, vector<8x512xf32> -> vector<8x512xf32>
    %194 = arith.addf %191, %193 : vector<8x512xf32>
    %195 = vector.extract_strided_slice %194 {offsets = [0, 0], sizes = [8, 128], strides = [1, 1]} : vector<8x512xf32> to vector<8x128xf32>
    %196 = arith.negf %195 : vector<8x128xf32>
    %197 = math.exp %196 : vector<8x128xf32>
    %cst_70 = arith.constant 1.000000e+00 : f32
    %198 = vector.broadcast %cst_70 : f32 to vector<8x128xf32>
    %199 = arith.addf %198, %197 : vector<8x128xf32>
    %200 = arith.divf %198, %199 : vector<8x128xf32>
    %201 = vector.extract_strided_slice %194 {offsets = [0, 128], sizes = [8, 128], strides = [1, 1]} : vector<8x512xf32> to vector<8x128xf32>
    %202 = arith.negf %201 : vector<8x128xf32>
    %203 = math.exp %202 : vector<8x128xf32>
    %cst_71 = arith.constant 1.000000e+00 : f32
    %204 = vector.broadcast %cst_71 : f32 to vector<8x128xf32>
    %205 = arith.addf %204, %203 : vector<8x128xf32>
    %206 = arith.divf %204, %205 : vector<8x128xf32>
    %207 = vector.extract_strided_slice %194 {offsets = [0, 256], sizes = [8, 128], strides = [1, 1]} : vector<8x512xf32> to vector<8x128xf32>
    %208 = math.tanh %207 : vector<8x128xf32>
    %209 = vector.extract_strided_slice %194 {offsets = [0, 384], sizes = [8, 128], strides = [1, 1]} : vector<8x512xf32> to vector<8x128xf32>
    %210 = arith.negf %209 : vector<8x128xf32>
    %211 = math.exp %210 : vector<8x128xf32>
    %cst_72 = arith.constant 1.000000e+00 : f32
    %212 = vector.broadcast %cst_72 : f32 to vector<8x128xf32>
    %213 = arith.addf %212, %211 : vector<8x128xf32>
    %214 = arith.divf %212, %213 : vector<8x128xf32>
    %215 = arith.mulf %206, %182 : vector<8x128xf32>
    %216 = arith.mulf %200, %208 : vector<8x128xf32>
    %217 = arith.addf %215, %216 : vector<8x128xf32>
    %218 = math.tanh %217 : vector<8x128xf32>
    %219 = arith.mulf %214, %218 : vector<8x128xf32>
    %220 = arith.index_cast %c5_i32 : i32 to index
    %c0_73 = arith.constant 0 : index
    %c0_74 = arith.constant 0 : index
    %221 = vector.load %arg12[%220, %c0_73, %c0_74] : memref<8x8x128xf32, #tpu.memory_space<vmem>>, vector<1x8x128xf32>
    %222 = vector.shape_cast %221 : vector<1x8x128xf32> to vector<8x128xf32>
    %223 = vector.shape_cast %219 : vector<8x128xf32> to vector<1x8x128xf32>
    tpu.vector_store %arg12[%220, %c0_73, %c0_74], %223 {strides = array<i32>} : memref<8x8x128xf32, #tpu.memory_space<vmem>>, vector<1x8x128xf32>,
    %c6_i32 = arith.constant 6 : i32
    %224 = arith.index_cast %c6_i32 : i32 to index
    %c0_75 = arith.constant 0 : index
    %c0_76 = arith.constant 0 : index
    %225 = vector.load %arg13[%224, %c0_75, %c0_76] : memref<8x8x512xf32, #tpu.memory_space<vmem>>, vector<1x8x512xf32>
    %226 = vector.shape_cast %225 : vector<1x8x512xf32> to vector<8x512xf32>
    %c0_77 = arith.constant 0 : index
    %c0_78 = arith.constant 0 : index
    %227 = vector.load %arg5[%c0_77, %c0_78] : memref<128x512xf32, #tpu.memory_space<vmem>>, vector<128x512xf32>
    %cst_79 = arith.constant dense<0.000000e+00> : vector<8x512xf32>
    %228 = tpu.matmul %219, %227, %cst_79 {dimension_numbers = #tpu.dot_dimension_numbers<[1], [0], [0], [1], [0, 0, 1, 1], [], []>} : vector<8x128xf32>, vector<128x512xf32>, vector<8x512xf32> -> vector<8x512xf32>
    %229 = arith.addf %226, %228 : vector<8x512xf32>
    %230 = vector.extract_strided_slice %229 {offsets = [0, 0], sizes = [8, 128], strides = [1, 1]} : vector<8x512xf32> to vector<8x128xf32>
    %231 = arith.negf %230 : vector<8x128xf32>
    %232 = math.exp %231 : vector<8x128xf32>
    %cst_80 = arith.constant 1.000000e+00 : f32
    %233 = vector.broadcast %cst_80 : f32 to vector<8x128xf32>
    %234 = arith.addf %233, %232 : vector<8x128xf32>
    %235 = arith.divf %233, %234 : vector<8x128xf32>
    %236 = vector.extract_strided_slice %229 {offsets = [0, 128], sizes = [8, 128], strides = [1, 1]} : vector<8x512xf32> to vector<8x128xf32>
    %237 = arith.negf %236 : vector<8x128xf32>
    %238 = math.exp %237 : vector<8x128xf32>
    %cst_81 = arith.constant 1.000000e+00 : f32
    %239 = vector.broadcast %cst_81 : f32 to vector<8x128xf32>
    %240 = arith.addf %239, %238 : vector<8x128xf32>
    %241 = arith.divf %239, %240 : vector<8x128xf32>
    %242 = vector.extract_strided_slice %229 {offsets = [0, 256], sizes = [8, 128], strides = [1, 1]} : vector<8x512xf32> to vector<8x128xf32>
    %243 = math.tanh %242 : vector<8x128xf32>
    %244 = vector.extract_strided_slice %229 {offsets = [0, 384], sizes = [8, 128], strides = [1, 1]} : vector<8x512xf32> to vector<8x128xf32>
    %245 = arith.negf %244 : vector<8x128xf32>
    %246 = math.exp %245 : vector<8x128xf32>
    %cst_82 = arith.constant 1.000000e+00 : f32
    %247 = vector.broadcast %cst_82 : f32 to vector<8x128xf32>
    %248 = arith.addf %247, %246 : vector<8x128xf32>
    %249 = arith.divf %247, %248 : vector<8x128xf32>
    %250 = arith.mulf %241, %217 : vector<8x128xf32>
    %251 = arith.mulf %235, %243 : vector<8x128xf32>
    %252 = arith.addf %250, %251 : vector<8x128xf32>
    %253 = math.tanh %252 : vector<8x128xf32>
    %254 = arith.mulf %249, %253 : vector<8x128xf32>
    %255 = arith.index_cast %c6_i32 : i32 to index
    %c0_83 = arith.constant 0 : index
    %c0_84 = arith.constant 0 : index
    %256 = vector.load %arg12[%255, %c0_83, %c0_84] : memref<8x8x128xf32, #tpu.memory_space<vmem>>, vector<1x8x128xf32>
    %257 = vector.shape_cast %256 : vector<1x8x128xf32> to vector<8x128xf32>
    %258 = vector.shape_cast %254 : vector<8x128xf32> to vector<1x8x128xf32>
    tpu.vector_store %arg12[%255, %c0_83, %c0_84], %258 {strides = array<i32>} : memref<8x8x128xf32, #tpu.memory_space<vmem>>, vector<1x8x128xf32>,
    %c7_i32 = arith.constant 7 : i32
    %259 = arith.index_cast %c7_i32 : i32 to index
    %c0_85 = arith.constant 0 : index
    %c0_86 = arith.constant 0 : index
    %260 = vector.load %arg13[%259, %c0_85, %c0_86] : memref<8x8x512xf32, #tpu.memory_space<vmem>>, vector<1x8x512xf32>
    %261 = vector.shape_cast %260 : vector<1x8x512xf32> to vector<8x512xf32>
    %c0_87 = arith.constant 0 : index
    %c0_88 = arith.constant 0 : index
    %262 = vector.load %arg5[%c0_87, %c0_88] : memref<128x512xf32, #tpu.memory_space<vmem>>, vector<128x512xf32>
    %cst_89 = arith.constant dense<0.000000e+00> : vector<8x512xf32>
    %263 = tpu.matmul %254, %262, %cst_89 {dimension_numbers = #tpu.dot_dimension_numbers<[1], [0], [0], [1], [0, 0, 1, 1], [], []>} : vector<8x128xf32>, vector<128x512xf32>, vector<8x512xf32> -> vector<8x512xf32>
    %264 = arith.addf %261, %263 : vector<8x512xf32>
    %265 = vector.extract_strided_slice %264 {offsets = [0, 0], sizes = [8, 128], strides = [1, 1]} : vector<8x512xf32> to vector<8x128xf32>
    %266 = arith.negf %265 : vector<8x128xf32>
    %267 = math.exp %266 : vector<8x128xf32>
    %cst_90 = arith.constant 1.000000e+00 : f32
    %268 = vector.broadcast %cst_90 : f32 to vector<8x128xf32>
    %269 = arith.addf %268, %267 : vector<8x128xf32>
    %270 = arith.divf %268, %269 : vector<8x128xf32>
    %271 = vector.extract_strided_slice %264 {offsets = [0, 128], sizes = [8, 128], strides = [1, 1]} : vector<8x512xf32> to vector<8x128xf32>
    %272 = arith.negf %271 : vector<8x128xf32>
    %273 = math.exp %272 : vector<8x128xf32>
    %cst_91 = arith.constant 1.000000e+00 : f32
    %274 = vector.broadcast %cst_91 : f32 to vector<8x128xf32>
    %275 = arith.addf %274, %273 : vector<8x128xf32>
    %276 = arith.divf %274, %275 : vector<8x128xf32>
    %277 = vector.extract_strided_slice %264 {offsets = [0, 256], sizes = [8, 128], strides = [1, 1]} : vector<8x512xf32> to vector<8x128xf32>
    %278 = math.tanh %277 : vector<8x128xf32>
    %279 = vector.extract_strided_slice %264 {offsets = [0, 384], sizes = [8, 128], strides = [1, 1]} : vector<8x512xf32> to vector<8x128xf32>
    %280 = arith.negf %279 : vector<8x128xf32>
    %281 = math.exp %280 : vector<8x128xf32>
    %cst_92 = arith.constant 1.000000e+00 : f32
    %282 = vector.broadcast %cst_92 : f32 to vector<8x128xf32>
    %283 = arith.addf %282, %281 : vector<8x128xf32>
    %284 = arith.divf %282, %283 : vector<8x128xf32>
    %285 = arith.mulf %276, %252 : vector<8x128xf32>
    %286 = arith.mulf %270, %278 : vector<8x128xf32>
    %287 = arith.addf %285, %286 : vector<8x128xf32>
    %288 = math.tanh %287 : vector<8x128xf32>
    %289 = arith.mulf %284, %288 : vector<8x128xf32>
    %290 = arith.index_cast %c7_i32 : i32 to index
    %c0_93 = arith.constant 0 : index
    %c0_94 = arith.constant 0 : index
    %291 = vector.load %arg12[%290, %c0_93, %c0_94] : memref<8x8x128xf32, #tpu.memory_space<vmem>>, vector<1x8x128xf32>
    %292 = vector.shape_cast %291 : vector<1x8x128xf32> to vector<8x128xf32>
    %293 = vector.shape_cast %289 : vector<8x128xf32> to vector<1x8x128xf32>
    tpu.vector_store %arg12[%290, %c0_93, %c0_94], %293 {strides = array<i32>} : memref<8x8x128xf32, #tpu.memory_space<vmem>>, vector<1x8x128xf32>,
    %c8_i32 = arith.constant 8 : i32
    %c0_95 = arith.constant 0 : index
    %c0_96 = arith.constant 0 : index
    %294 = vector.load %arg10[%c0_95, %c0_96] : memref<8x128xf32, #tpu.memory_space<vmem>>, vector<8x128xf32>
    tpu.vector_store %arg10[%c0_95, %c0_96], %289 {strides = array<i32>} : memref<8x128xf32, #tpu.memory_space<vmem>>, vector<8x128xf32>,
    %c0_97 = arith.constant 0 : index
    %c0_98 = arith.constant 0 : index
    %295 = vector.load %arg11[%c0_97, %c0_98] : memref<8x128xf32, #tpu.memory_space<vmem>>, vector<8x128xf32>
    tpu.vector_store %arg11[%c0_97, %c0_98], %287 {strides = array<i32>} : memref<8x128xf32, #tpu.memory_space<vmem>>, vector<8x128xf32>,
    %c0_99 = arith.constant 0 : index
    %c0_100 = arith.constant 0 : index
    %c0_101 = arith.constant 0 : index
    %296 = vector.load %arg12[%c0_99, %c0_100, %c0_101] : memref<8x8x128xf32, #tpu.memory_space<vmem>>, vector<8x8x128xf32>
    %297 = tpu.transpose %296, [1, 0, 2] : vector<8x8x128xf32> -> vector<8x8x128xf32>
    %c8_i32_102 = arith.constant 8 : i32
    %298 = arith.muli %arg1, %c8_i32_102 : i32
    %299 = tpu.iota {dimensions = array<i32: 1>} : vector<8x8x1xi32>
    %300 = vector.broadcast %298 : i32 to vector<8x8x1xi32>
    %301 = arith.addi %299, %300 : vector<8x8x1xi32>
    %c0_103 = arith.constant 0 : index
    %c0_104 = arith.constant 0 : index
    %302 = vector.load %arg3[%c0_103, %c0_104] : memref<8x1xi32, #tpu.memory_space<vmem>>, vector<8x1xi32>
    %303 = vector.shape_cast %302 : vector<8x1xi32> to vector<8x1x1xi32>
    %304 = vector.broadcast %303 : vector<8x1x1xi32> to vector<8x8x1xi32>
    %305 = arith.cmpi slt, %301, %304 : vector<8x8x1xi32>
    %cst_105 = arith.constant 0.000000e+00 : f32
    %306 = vector.shape_cast %305 : vector<8x8x1xi1> to vector<8x8x1xi1>
    %307 = vector.broadcast %306 : vector<8x8x1xi1> to vector<8x8x128xi1>
    %308 = vector.broadcast %cst_105 : f32 to vector<8x8x128xf32>
    %309 = arith.select %307, %297, %308 : vector<8x8x128xi1>, vector<8x8x128xf32>
    %310 = vector.shape_cast %309 : vector<8x8x128xf32> to vector<64x128xf32>
    %c0_106 = arith.constant 0 : index
    %c0_107 = arith.constant 0 : index
    %311 = vector.load %arg7[%c0_106, %c0_107] : memref<128x128xf32, #tpu.memory_space<vmem>>, vector<128x128xf32>
    %cst_108 = arith.constant dense<0.000000e+00> : vector<64x128xf32>
    %312 = tpu.matmul %310, %311, %cst_108 {dimension_numbers = #tpu.dot_dimension_numbers<[1], [0], [0], [1], [0, 0, 1, 1], [], []>} : vector<64x128xf32>, vector<128x128xf32>, vector<64x128xf32> -> vector<64x128xf32>
    %c0_109 = arith.constant 0 : index
    %c0_110 = arith.constant 0 : index
    %313 = vector.load %arg8[%c0_109, %c0_110] : memref<1x128xf32, #tpu.memory_space<vmem>>, vector<1x128xf32>
    %314 = vector.broadcast %313 : vector<1x128xf32> to vector<64x128xf32>
    %315 = arith.addf %312, %314 : vector<64x128xf32>
    %316 = vector.shape_cast %315 : vector<64x128xf32> to vector<8x8x128xf32>
    %c0_111 = arith.constant 0 : index
    %c0_112 = arith.constant 0 : index
    %c0_113 = arith.constant 0 : index
    %317 = vector.load %arg9[%c0_111, %c0_112, %c0_113] : memref<8x8x128xf32, #tpu.memory_space<vmem>>, vector<8x8x128xf32>
    tpu.vector_store %arg9[%c0_111, %c0_112, %c0_113], %316 {strides = array<i32>} : memref<8x8x128xf32, #tpu.memory_space<vmem>>, vector<8x8x128xf32>,
    return
  }
  func.func @transform_0(%arg0: i32, %arg1: i32) -> (i32, i32, i32) {
    %c0_i32 = arith.constant 0 : i32
    %c0_i32_0 = arith.constant 0 : i32
    return %arg1, %arg0, %c0_i32 : i32, i32, i32
  }
  func.func @transform_1(%arg0: i32, %arg1: i32) -> (i32, i32) {
    %c0_i32 = arith.constant 0 : i32
    %c0_i32_0 = arith.constant 0 : i32
    return %arg0, %c0_i32 : i32, i32
  }
  func.func @transform_2(%arg0: i32, %arg1: i32) -> (i32, i32) {
    %c0_i32 = arith.constant 0 : i32
    %c0_i32_0 = arith.constant 0 : i32
    %c0_i32_1 = arith.constant 0 : i32
    return %c0_i32, %c0_i32_0 : i32, i32
  }
  func.func @transform_3(%arg0: i32, %arg1: i32) -> (i32, i32) {
    %c0_i32 = arith.constant 0 : i32
    %c0_i32_0 = arith.constant 0 : i32
    %c0_i32_1 = arith.constant 0 : i32
    return %c0_i32, %c0_i32_0 : i32, i32
  }
  func.func @transform_4(%arg0: i32, %arg1: i32) -> (i32, i32) {
    %c0_i32 = arith.constant 0 : i32
    %c0_i32_0 = arith.constant 0 : i32
    %c0_i32_1 = arith.constant 0 : i32
    return %c0_i32, %c0_i32_0 : i32, i32
  }
  func.func @transform_5(%arg0: i32, %arg1: i32) -> (i32, i32) {
    %c0_i32 = arith.constant 0 : i32
    %c0_i32_0 = arith.constant 0 : i32
    %c0_i32_1 = arith.constant 0 : i32
    return %c0_i32, %c0_i32_0 : i32, i32
  }
  func.func @transform_6(%arg0: i32, %arg1: i32) -> (i32, i32) {
    %c0_i32 = arith.constant 0 : i32
    %c0_i32_0 = arith.constant 0 : i32
    %c0_i32_1 = arith.constant 0 : i32
    return %c0_i32, %c0_i32_0 : i32, i32
  }
  func.func @transform_7(%arg0: i32, %arg1: i32) -> (i32, i32, i32) {
    %c0_i32 = arith.constant 0 : i32
    %c0_i32_0 = arith.constant 0 : i32
    return %arg0, %arg1, %c0_i32 : i32, i32, i32
  }
}

</mosaic_0001>

<bundles_post_ra>
// kernel: _forward_impl.1
= control target key start
LH: loop header
LB: loop body
LE: loop exit
PB: predicated region body
PF: predicated region fallthrough
CT: control target
= control target key end

     0   :  { %v3595_v3 = vmov 0.0   ;;  %vm78_vm0 = vcmask 261120   ;;  %s4886_s2 = inlined_call_operand.vmem [shape: f32[32,512], index: 2, kind: input, shape index: {}]   ;;  %s4887_s3 = inlined_call_operand.vmem [shape: f32[128,512], index: 3, kind: input, shape index: {}]   ;;  %s4888_s0 = inlined_call_operand.vmem [shape: f32[8,8,32], index: 0, kind: input, shape index: {}]   ;;  %s4889_s4 = inlined_call_operand.vmem [shape: f32[1,512], index: 4, kind: input, shape index: {}]   ;;  %s4890_s1 = inlined_call_operand.vmem [shape: s32[8,1], index: 1, kind: input, shape index: {}]   ;;  %s4891_s5 = inlined_call_operand.vmem [shape: f32[128,128], index: 5, kind: input, shape index: {}]   ;;  %s4892_s6 = inlined_call_operand.vmem [shape: f32[1,128], index: 6, kind: input, shape index: {}]   ;;  %s4893_s7 = inlined_call_operand.vmem [shape: f32[8,8,128], index: 7, kind: output, shape index: {}]  }
   0x1   :  { %v43_v0 = vld [vmem:[%s4886_s2 + $0x18] sm:$0xff]  ;;  %v42_v2 = vld [vmem:[%s4886_s2 + $0x10] sm:$0xff]  ;;  %280 = vmatprep.mubr.f32.mxu1 %v3595_v3  ;;  %167 = vmatprep.mubr.f32.mxu0 %v3595_v3  ;;  %v368_v12 = vld [vmem:[%s4887_s3 + $0x8] sm:$0xff] }
   0x2   :  { %v47_v1 = vld [vmem:[%s4886_s2 + $0x38] sm:$0xff]  ;;  %v46_v5 = vld [vmem:[%s4886_s2 + $0x30] sm:$0xff]  ;;  %v372_v13 = vld [vmem:[%s4887_s3 + $0x28] sm:$0xff] }
   0x3   :  { %v2843_v4 = vpack.c.bf16 %v47_v1, %v43_v0  ;;  %v51_v6 = vld [vmem:[%s4886_s2 + $0x58] sm:$0xff]  ;;  %v2845_v8 = vpack.c.bf16 %v46_v5, %v42_v2  ;;  %v50_v10 = vld [vmem:[%s4886_s2 + $0x50] sm:$0xff]  ;;  %v3672_v15 = vpack.c.bf16 %v372_v13, %v368_v12  ;;  %v367_v16 = vld [vmem:[%s4887_s3] sm:$0xff] }
   0x4   :  { %v55_v7 = vld [vmem:[%s4886_s2 + $0x78] sm:$0xff]  ;;  %v54_v11 = vld [vmem:[%s4886_s2 + $0x70] sm:$0xff]  ;;  %v371_v17 = vld [vmem:[%s4887_s3 + $0x20] sm:$0xff] }
   0x5   :  { %v2847_v9 = vpack.c.bf16 %v55_v7, %v51_v6  ;;  %2844 = vmatprep.subr.bf16.mxu1 %v2843_v4  ;;  %v2849_v14 = vpack.c.bf16 %v54_v11, %v50_v10  ;;  %v376_v18 = vld [vmem:[%s4887_s3 + $0x48] sm:$0xff]  ;;  %v3689_v20 = vld [vmem:[%s4888_s0] sm:$0xff]  ;;  %v3691_v21 = vpack.c.bf16 %v371_v17, %v367_v16  ;;  %v3751_v40 = vld [vmem:[%s4888_s0 + $0x10] sm:$0xff] }
   0x6   :  { %2846 = vmatpush1.bf16.msra.mxu1 %v2845_v8  ;;  %v380_v19 = vld [vmem:[%s4887_s3 + $0x68] sm:$0xff]  ;;  %v375_v23 = vld [vmem:[%s4887_s3 + $0x40] sm:$0xff]  ;;  %v3791_v53 = vld [vmem:[%s4888_s0 + $0x18] sm:$0xff] }
   0x7   :  { %2848 = vmatprep.subr.bf16.mxu1 %v2847_v9  ;;  %v3694_v22 = vpack.c.bf16 %v380_v19, %v376_v18  ;;  %v379_v24 = vld [vmem:[%s4887_s3 + $0x60] sm:$0xff]  ;;  %v384_v25 = vld [vmem:[%s4887_s3 + $0x88] sm:$0xff]  ;;  %v38_v11 = vld [vmem:[%s4888_s0 + $0x30] sm:$0xff] }
   0x8   :  { %v388_v26 = vld [vmem:[%s4887_s3 + $0xa8] sm:$0xff]  ;;  %v3717_v28 = vpack.c.bf16 %v379_v24, %v375_v23  ;;  %v383_v29 = vld [vmem:[%s4887_s3 + $0x80] sm:$0xff]  ;;  %v370_v17 = vld [vmem:[%s4887_s3 + $0x18] sm:$0xff] }
   0x9   :  { %v3713_v27 = vld [vmem:[%s4888_s0 + $0x8] sm:$0xff]  ;;  %v387_v30 = vld [vmem:[%s4887_s3 + $0xa0] sm:$0xff]  ;;  %v3729_v32 = vpack.c.bf16 %v388_v26, %v384_v25  ;;  %v374_v18 = vld [vmem:[%s4887_s3 + $0x38] sm:$0xff] }
   0xa   :  { %2850 = vmatpush1.bf16.msra.mxu1 %v2849_v14  ;;  %v41_v31 = vld [vmem:[%s4886_s2 + $0x8] sm:$0xff]  ;;  %v40_v34 = vld [vmem:[%s4886_s2] sm:$0xff]  ;;  %v3758_v42 = vpack.c.bf16 %v387_v30, %v383_v29  ;;  %v39_v19 = vld [vmem:[%s4888_s0 + $0x38] sm:$0xff]  ;;  %v3911_v23 = vpack.c.bf16 %v374_v18, %v370_v17  ;;  %v58_v18 = vlaneseq }
   0xb   :  { %2852 = vmatprep.subr.bf16.mxu1 %v3672_v15  ;;  %v45_v33 = vld [vmem:[%s4886_s2 + $0x28] sm:$0xff]  ;;  %v44_v35 = vld [vmem:[%s4886_s2 + $0x20] sm:$0xff]  ;;  %v369_v24 = vld [vmem:[%s4887_s3 + $0x10] sm:$0xff] }
   0xc   :  { %v392_v36 = vld [vmem:[%s4887_s3 + $0xc8] sm:$0xff]  ;;  %v2835_v38 = vpack.c.bf16 %v45_v33, %v41_v31  ;;  %v2837_v39 = vpack.c.bf16 %v44_v35, %v40_v34  ;;  %v48_v44 = vld [vmem:[%s4886_s2 + $0x40] sm:$0xff]  ;;  %v373_v25 = vld [vmem:[%s4887_s3 + $0x30] sm:$0xff] }
   0xd   :  { %2726 = vmatmul.mubr.msk.f32.vlgmr.msra.gmra.mrb[0].mxu1 %vm78_vm0, %v3689_v20  ;;  %v396_v37 = vld [vmem:[%s4887_s3 + $0xe8] sm:$0xff]  ;;  %v52_v45 = vld [vmem:[%s4886_s2 + $0x60] sm:$0xff]  ;;  %v378_v26 = vld [vmem:[%s4887_s3 + $0x58] sm:$0xff]  ;;  %v3933_v29 = vpack.c.bf16 %v373_v25, %v369_v24  ;;  %v4096_v25 = vshrl.u32 %v58_v18, 7 }
   0xe   :  { %2854 = vmatpush1.bf16.msra.mxu1 %v3691_v21  ;;  %286 = vmatprep.mubr.f32.mxu1 %v3595_v3  ;;  %v49_v41 = vld [vmem:[%s4886_s2 + $0x48] sm:$0xff]  ;;  %v3770_v46 = vpack.c.bf16 %v396_v37, %v392_v36  ;;  %v391_v47 = vld [vmem:[%s4887_s3 + $0xc0] sm:$0xff]  ;;  %v2841_v52 = vpack.c.bf16 %v52_v45, %v48_v44  ;;  %v377_v31 = vld [vmem:[%s4887_s3 + $0x50] sm:$0xff] }
   0xf   :  { %2856 = vmatprep.subr.bf16.mxu1 %v3694_v22  ;;  %v53_v43 = vld [vmem:[%s4886_s2 + $0x68] sm:$0xff]  ;;  %v395_v48 = vld [vmem:[%s4887_s3 + $0xe0] sm:$0xff]  ;;  %2836 = vmatprep.subr.bf16.mxu0 %v2835_v38  ;;  %v381_v33 = vld [vmem:[%s4887_s3 + $0x70] sm:$0xff] }
  0x10   :  { %v2839_v49 = vpack.c.bf16 %v53_v43, %v49_v41  ;;  %v400_v50 = vld [vmem:[%s4887_s3 + $0x108] sm:$0xff]  ;;  %2838 = vmatpush1.bf16.msra.mxu0 %v2837_v39  ;;  %v3793_v54 = vpack.c.bf16 %v395_v48, %v391_v47  ;;  %v399_v56 = vld [vmem:[%s4887_s3 + $0x100] sm:$0xff]  ;;  %v386_v34 = vld [vmem:[%s4887_s3 + $0x98] sm:$0xff]  ;;  %v3957_v36 = vpack.c.bf16 %v381_v33, %v377_v31  ;;  %v64_v31 = vsub.s32 1, %v4096_v25 }
  0x11   :  { %2727 = vmatmul.mubr.msk.f32.gmra.mrb[2].mxu1 %vm78_vm0, %v3713_v27  ;;  %v404_v51 = vld [vmem:[%s4887_s3 + $0x128] sm:$0xff]  ;;  %v403_v57 = vld [vmem:[%s4887_s3 + $0x120] sm:$0xff]  ;;  %v390_v35 = vld [vmem:[%s4887_s3 + $0xb8] sm:$0xff] }
  0x12   :  { %2858 = vmatpush1.bf16.msra.mxu1 %v3717_v28  ;;  %292 = vmatprep.mubr.f32.mxu1 %v3595_v3  ;;  %v3796_v55 = vpack.c.bf16 %v404_v51, %v400_v50  ;;  %v408_v58 = vld [vmem:[%s4887_s3 + $0x148] sm:$0xff]  ;;  %v3818_v60 = vld [vmem:[%s4888_s0 + $0x20] sm:$0xff]  ;;  %v3820_v61 = vpack.c.bf16 %v403_v57, %v399_v56  ;;  %v3961_v37 = vpack.c.bf16 %v390_v35, %v386_v34  ;;  %v385_v38 = vld [vmem:[%s4887_s3 + $0x90] sm:$0xff] }
  0x13   :  { %2860 = vmatprep.subr.bf16.mxu1 %v3729_v32  ;;  %2840 = vmatprep.subr.bf16.mxu0 %v2839_v49  ;;  %v412_v59 = vld [vmem:[%s4887_s3 + $0x168] sm:$0xff]  ;;  %v407_v63 = vld [vmem:[%s4887_s3 + $0x140] sm:$0xff]  ;;  %v389_v39 = vld [vmem:[%s4887_s3 + $0xb0] sm:$0xff] }
  0x14   :  { %2842 = vmatpush1.bf16.msra.mxu0 %v2841_v52  ;;  %v3823_v62 = vpack.c.bf16 %v412_v59, %v408_v58  ;;  %v411_v0 = vld [vmem:[%s4887_s3 + $0x160] sm:$0xff]  ;;  %v416_v1 = vld [vmem:[%s4887_s3 + $0x188] sm:$0xff]  ;;  %v398_v41 = vld [vmem:[%s4887_s3 + $0xf8] sm:$0xff]  ;;  %v3981_v43 = vpack.c.bf16 %v389_v39, %v385_v38 }
  0x15   :  { %2728 = vmatmul.mubr.msk.f32.gmra.mrb[4].mxu1 %vm78_vm0, %v3751_v40  ;;  %2916 = vmatprep.subr.bf16.mxu0 %v3672_v15  ;;  %v420_v2 = vld [vmem:[%s4887_s3 + $0x1a8] sm:$0xff]  ;;  %v3851_v5 = vpack.c.bf16 %v411_v0, %v407_v63  ;;  %v415_v7 = vld [vmem:[%s4887_s3 + $0x180] sm:$0xff]  ;;  %v393_v45 = vld [vmem:[%s4887_s3 + $0xd0] sm:$0xff] }
  0x16   :  { %2862 = vmatpush1.bf16.msra.mxu1 %v3758_v42  ;;  %298 = vmatprep.mubr.f32.mxu1 %v3595_v3  ;;  %v3849_v4 = vld [vmem:[%s4888_s0 + $0x28] sm:$0xff]  ;;  %v3854_v6 = vpack.c.bf16 %v420_v2, %v416_v1  ;;  %v419_v8 = vld [vmem:[%s4887_s3 + $0x1a0] sm:$0xff]  ;;  %v397_v47 = vld [vmem:[%s4887_s3 + $0xf0] sm:$0xff] }
  0x17   :  { %2864 = vmatprep.subr.bf16.mxu1 %v3770_v46  ;;  %2718 = vmatmul.mubr.msk.f32.vlgmr.msra.gmra.mrb[0].mxu0 %vm78_vm0, %v3689_v20  ;;  %v424_v9 = vld [vmem:[%s4887_s3 + $0x1c8] sm:$0xff]  ;;  %v3880_v12 = vpack.c.bf16 %v419_v8, %v415_v7  ;;  %v423_v14 = vld [vmem:[%s4887_s3 + $0x1c0] sm:$0xff]  ;;  %v402_v48 = vld [vmem:[%s4887_s3 + $0x118] sm:$0xff]  ;;  %v4003_v50 = vpack.c.bf16 %v397_v47, %v393_v45 }
  0x18   :  { %2918 = vmatpush1.bf16.msra.mxu0 %v3691_v21  ;;  %173 = vmatprep.mubr.f32.mxu0 %v3595_v3  ;;  %v428_v10 = vld [vmem:[%s4887_s3 + $0x1e8] sm:$0xff]  ;;  %v427_v16 = vld [vmem:[%s4887_s3 + $0x1e0] sm:$0xff]  ;;  %v406_v49 = vld [vmem:[%s4887_s3 + $0x138] sm:$0xff] }
  0x19   :  { %2729 = vmatmul.mubr.msk.f32.gmra.mrb[6].mxu1 %vm78_vm0, %v3791_v53  ;;  %2920 = vmatprep.subr.bf16.mxu0 %v3694_v22  ;;  %v3883_v13 = vpack.c.bf16 %v428_v10, %v424_v9  ;;  %v3908_v20 = vpack.c.bf16 %v427_v16, %v423_v14  ;;  %v4006_v51 = vpack.c.bf16 %v406_v49, %v402_v48  ;;  %v401_v52 = vld [vmem:[%s4887_s3 + $0x110] sm:$0xff]  ;;  %v410_v56 = vld [vmem:[%s4887_s3 + $0x158] sm:$0xff]  ;;  %v68_v49 = vsub.s32 2, %v4096_v25 }
  0x1a   :  { %2866 = vmatpush1.bf16.msra.mxu1 %v3793_v54  ;;  %304 = vmatprep.mubr.f32.mxu1 %v3595_v3  ;;  %v414_v57 = vld [vmem:[%s4887_s3 + $0x178] sm:$0xff]  ;;  %v413_v63 = vld [vmem:[%s4887_s3 + $0x170] sm:$0xff] }
  0x1b   :  { %2868 = vmatprep.subr.bf16.mxu1 %v3796_v55  ;;  %2719 = vmatmul.mubr.msk.f32.gmra.mrb[2].mxu0 %vm78_vm0, %v3713_v27  ;;  %v382_v27 = vld [vmem:[%s4887_s3 + $0x78] sm:$0xff]  ;;  %v4028_v59 = vpack.c.bf16 %v414_v57, %v410_v56  ;;  %v421_v7 = vld [vmem:[%s4887_s3 + $0x1b0] sm:$0xff] }
  0x1c   :  { %2922 = vmatpush1.bf16.msra.mxu0 %v3717_v28  ;;  %179 = vmatprep.mubr.f32.mxu0 %v3595_v3  ;;  %v3936_v30 = vpack.c.bf16 %v382_v27, %v378_v26  ;;  %v422_v0 = vld [vmem:[%s4887_s3 + $0x1b8] sm:$0xff]  ;;  %v425_v14 = vld [vmem:[%s4887_s3 + $0x1d0] sm:$0xff]  ;;  %v4099_v26 = vsub.s32 0, %v4096_v25  ;;  %v56_v27 = vld [vmem:[%s4889_s4] sm:$0xf] }
  0x1d   :  { %2730 = vmatmul.mubr.msk.f32.gmra.mrb[8].mxu1 %vm78_vm0, %v3818_v60  ;;  %2924 = vmatprep.subr.bf16.mxu0 %v3729_v32  ;;  %v426_v8 = vld [vmem:[%s4887_s3 + $0x1d8] sm:$0xff]  ;;  %v429_v16 = vld [vmem:[%s4887_s3 + $0x1f0] sm:$0xff]  ;;  %v4108_v34 = vrot.slane %v56_v27, %v64_v31 }
  0x1e   :  { %2870 = vmatpush1.bf16.msra.mxu1 %v3820_v61  ;;  %310 = vmatprep.mubr.f32.mxu1 %v3595_v3  ;;  %v430_v9 = vld [vmem:[%s4887_s3 + $0x1f8] sm:$0xff]  ;;  %v4073_v17 = vpack.c.bf16 %v429_v16, %v425_v14  ;;  %v4106_v33 = vrot.slane %v56_v27, %v4099_v26 }
  0x1f   :  { %2872 = vmatprep.subr.bf16.mxu1 %v3823_v62  ;;  %2720 = vmatmul.mubr.msk.f32.gmra.mrb[4].mxu0 %vm78_vm0, %v3751_v40  ;;  %v394_v40 = vld [vmem:[%s4887_s3 + $0xd8] sm:$0xff] }
  0x20   :  { %2926 = vmatpush1.bf16.msra.mxu0 %v3758_v42  ;;  %185 = vmatprep.mubr.f32.mxu0 %v3595_v3  ;;  %v3984_v44 = vpack.c.bf16 %v398_v41, %v394_v40 }
  0x21   :  { %2731 = vmatmul.mubr.msk.f32.gmra.mrb[10].mxu1 %vm78_vm0, %v3849_v4  ;;  %2928 = vmatprep.subr.bf16.mxu0 %v3770_v46 }
  0x22   :  { %2874 = vmatpush1.bf16.msra.mxu1 %v3851_v5  ;;  %316 = vmatprep.mubr.f32.mxu1 %v3595_v3 }
  0x23   :  { %2876 = vmatprep.subr.bf16.mxu1 %v3854_v6  ;;  %2721 = vmatmul.mubr.msk.f32.gmra.mrb[6].mxu0 %vm78_vm0, %v3791_v53  ;;  %v405_v53 = vld [vmem:[%s4887_s3 + $0x130] sm:$0xff] }
  0x24   :  { %2930 = vmatpush1.bf16.msra.mxu0 %v3793_v54  ;;  %191 = vmatprep.mubr.f32.mxu0 %v3595_v3  ;;  %v4025_v58 = vpack.c.bf16 %v405_v53, %v401_v52  ;;  %v72_v53 = vsub.s32 3, %v4096_v25 }
  0x25   :  { %2732 = vmatmul.mubr.msk.f32.gmra.mrb[12].mxu1 %vm78_vm0, %v38_v11  ;;  %2932 = vmatprep.subr.bf16.mxu0 %v3796_v55 }
  0x26   :  { %2878 = vmatpush1.bf16.msra.mxu1 %v3880_v12  ;;  %322 = vmatprep.mubr.f32.mxu1 %v3595_v3 }
  0x27   :  { %2880 = vmatprep.subr.bf16.mxu1 %v3883_v13  ;;  %2722 = vmatmul.mubr.msk.f32.gmra.mrb[8].mxu0 %vm78_vm0, %v3818_v60  ;;  %v409_v60 = vld [vmem:[%s4887_s3 + $0x150] sm:$0xff] }
  0x28   :  { %2934 = vmatpush1.bf16.msra.mxu0 %v3820_v61  ;;  %197 = vmatprep.mubr.f32.mxu0 %v3595_v3  ;;  %v4043_v1 = vpack.c.bf16 %v413_v63, %v409_v60  ;;  %v4114_v60 = vrot.slane %v56_v27, %v68_v49 }
  0x29   :  { %2733 = vmatmul.mubr.msk.f32.gmra.mrb[14].mxu1 %vm78_vm0, %v39_v19  ;;  %2936 = vmatprep.subr.bf16.mxu0 %v3823_v62 }
  0x2a   :  { %2882 = vmatpush1.bf16.msra.mxu1 %v3908_v20  ;;  %495 = vmatprep.mubr.f32.mxu1 %v3595_v3 }
  0x2b   :  { %2884 = vmatprep.subr.bf16.mxu1 %v3911_v23  ;;  %2723 = vmatmul.mubr.msk.f32.gmra.mrb[10].mxu0 %vm78_vm0, %v3849_v4  ;;  %v417_v4 = vld [vmem:[%s4887_s3 + $0x190] sm:$0xff] }
  0x2c   :  { %2938 = vmatpush1.bf16.msra.mxu0 %v3851_v5  ;;  %203 = vmatprep.mubr.f32.mxu0 %v3595_v3  ;;  %v4061_v10 = vpack.c.bf16 %v421_v7, %v417_v4 }
  0x2d   :  { %496 = vmatmul.mubr.f32.vlgmr.msra.gmra.mrb[16].mxu1 %v3595_v3  ;;  %2940 = vmatprep.subr.bf16.mxu0 %v3854_v6 }
  0x2e   :  { %2886 = vmatpush1.bf16.msra.mxu1 %v3933_v29  ;;  %566 = vmatprep.mubr.f32.mxu1 %v3595_v3 }
  0x2f   :  { %2888 = vmatprep.subr.bf16.mxu1 %v3936_v30  ;;  %2724 = vmatmul.mubr.msk.f32.gmra.mrb[12].mxu0 %vm78_vm0, %v38_v11  ;;  %v4064_v11 = vpack.c.bf16 %v430_v9, %v426_v8 }
  0x30   :  { %2942 = vmatpush1.bf16.msra.mxu0 %v3880_v12  ;;  %209 = vmatprep.mubr.f32.mxu0 %v3595_v3 }
  0x31   :  { %2944 = vmatprep.subr.bf16.mxu0 %v3883_v13 }
  0x32   :  { %2890 = vmatpush1.bf16.msra.mxu1 %v3957_v36 }
  0x33   :  { %2892 = vmatprep.subr.bf16.mxu1 %v3961_v37  ;;  %2725 = vmatmul.mubr.msk.f32.gmra.mrb[14].mxu0 %vm78_vm0, %v39_v19 }
  0x34   :  { %2946 = vmatpush1.bf16.msra.mxu0 %v3908_v20  ;;  %735 = vmatprep.mubr.f32.mxu0 %v3595_v3 }
  0x35   :  { %2980 = vmatprep.subr.bf16.mxu0 %v3672_v15  ;;  %v418_v15 = vld [vmem:[%s4887_s3 + $0x198] sm:$0xff] }
  0x36   :  { %2894 = vmatpush1.bf16.msra.mxu1 %v3981_v43  ;;  %v4046_v2 = vpack.c.bf16 %v422_v0, %v418_v15  ;;  %v4116_v15 = vrot.slane %v56_v27, %v72_v53 }
  0x37   :  { %2896 = vmatprep.subr.bf16.mxu1 %v3984_v44 }
  0x3a   :  { %2898 = vmatpush1.bf16.msra.mxu1 %v4003_v50 }
  0x3b   :  { %2900 = vmatprep.subr.bf16.mxu1 %v4006_v51 }
  0x3e   :  { %2902 = vmatpush1.bf16.msra.mxu1 %v4025_v58 }
  0x3f   :  { %2904 = vmatprep.subr.bf16.mxu1 %v4028_v59 }
  0x42   :  { %2906 = vmatpush1.bf16.msra.mxu1 %v4043_v1 }
  0x43   :  { %2908 = vmatprep.subr.bf16.mxu1 %v4046_v2 }
  0x46   :  { %2910 = vmatpush1.bf16.msra.mxu1 %v4061_v10 }
  0x47   :  { %2912 = vmatprep.subr.bf16.mxu1 %v4064_v11 }
  0x4a   :  { %2914 = vmatpush1.bf16.msra.mxu1 %v4073_v17 }
  0x4b   :  { %2948 = vmatprep.subr.bf16.mxu1 %v3911_v23 }
  0x4d   :  { %567 = vmatmul.mubr.f32.vlgmr.msra.gmra.mrb[0].mxu1 %v3595_v3 }
  0x4e   :  { %2950 = vmatpush1.bf16.msra.mxu1 %v3933_v29  ;;  %806 = vmatprep.mubr.f32.mxu1 %v3595_v3 }
  0x4f   :  { %2952 = vmatprep.subr.bf16.mxu1 %v3936_v30 }
  0x52   :  { %2954 = vmatpush1.bf16.msra.mxu1 %v3957_v36 }
  0x53   :  { %2956 = vmatprep.subr.bf16.mxu1 %v3961_v37 }
  0x56   :  { %2958 = vmatpush1.bf16.msra.mxu1 %v3981_v43 }
  0x57   :  { %2960 = vmatprep.subr.bf16.mxu1 %v3984_v44 }
  0x5a   :  { %2962 = vmatpush1.bf16.msra.mxu1 %v4003_v50 }
  0x5b   :  { %2964 = vmatprep.subr.bf16.mxu1 %v4006_v51 }
  0x5e   :  { %2966 = vmatpush1.bf16.msra.mxu1 %v4025_v58 }
  0x5f   :  { %2968 = vmatprep.subr.bf16.mxu1 %v4028_v59 }
  0x62   :  { %2970 = vmatpush1.bf16.msra.mxu1 %v4043_v1 }
  0x63   :  { %2972 = vmatprep.subr.bf16.mxu1 %v4046_v2 }
  0x66   :  { %2974 = vmatpush1.bf16.msra.mxu1 %v4061_v10 }
  0x67   :  { %2976 = vmatprep.subr.bf16.mxu1 %v4064_v11 }
  0x6a   :  { %2978 = vmatpush1.bf16.msra.mxu1 %v4073_v17 }
  0x6b   :  { %3012 = vmatprep.subr.bf16.mxu1 %v3911_v23 }
  0xea   :  { %v169_v19 = vpop.f32.mrb[0].mxu0 }
  0xeb   :  { %v171_v24 = vpop.f32.mrb[1].mxu0  ;;  %v170_v35 = vadd.f32 %v169_v19, %v4106_v33 }
  0xec   :  { %v172_v38 = vadd.f32 %v171_v24, %v4108_v34 }
 0x100   :  { %v497_v39 = vpop.f32.mrb[16].mxu1 }
 0x101   :  { %v573_v40 = vadd.f32 %v497_v39, %v170_v35  ;;  %v499_v41 = vpop.f32.mrb[17].mxu1 }
 0x102   :  { %v574_v45 = vadd.f32 %v499_v41, %v172_v38 }
 0x103   :  { %v2734_v48 = vmul.f32 -1.442695, %v573_v40 }
 0x104   :  { %v2735_v47 = vmul.f32 -1.442695, %v574_v45 }
 0x106   :  { %3467 = vpow2.f32 %v2735_v47 }
 0x107   :  { %3469 = vpow2.f32 %v2734_v48 }
 0x110   :  { %v3468_v52 = vpop.eup %3467 }
 0x111   :  { %v3470_v56 = vpop.eup %3469  ;;  %v586_v57 = vadd.f32 1.0, %v3468_v52 }
 0x112   :  { %v580_v63 = vadd.f32 1.0, %v3470_v56 }
 0x113   :  { %3471 = vrcp.f32 %v586_v57 }
 0x114   :  { %3473 = vrcp.f32 %v580_v63 }
 0x11d   :  { %v3472_v14 = vpop.eup %3471 }
 0x11e   :  { %v3474_v16 = vpop.eup %3473  ;;  %v596_v19 = vmul.f32 0.0, %v3472_v14 }
 0x120   :  { %v568_v0 = vpop.f32.mrb[0].mxu1 }
 0x121   :  { %v3413_v4 = vadd.f32 %v568_v0, %v4114_v60  ;;  %v570_v7 = vpop.f32.mrb[1].mxu1  ;;  %v1105_v0 = vld [vmem:[%s4887_s3 + $0x80] sm:$0xff] }
 0x122   :  { %v3414_v8 = vadd.f32 %v570_v7, %v4116_v15 }
 0x123   :  { %3475 = vtanh.f32 %v3413_v4  ;;  %v1109_v4 = vld [vmem:[%s4887_s3 + $0xa0] sm:$0xff] }
 0x124   :  { %v2736_v9 = vmul.f32 -1.442695, %v3414_v8  ;;  %v4239_v7 = vpack.c.bf16 %v1109_v4, %v1105_v0  ;;  %v1114_v8 = vld [vmem:[%s4887_s3 + $0xc8] sm:$0xff] }
 0x126   :  { %3477 = vpow2.f32 %v2736_v9  ;;  %v1118_v9 = vld [vmem:[%s4887_s3 + $0xe8] sm:$0xff] }
 0x127   :  { %v4249_v14 = vpack.c.bf16 %v1118_v9, %v1114_v8 }
 0x12d   :  { %v3476_v18 = vpop.eup %3475 }
 0x12e   :  { %v597_v24 = vmul.f32 %v3476_v18, %v3474_v16  ;;  %v1113_v16 = vld [vmem:[%s4887_s3 + $0xc0] sm:$0xff] }
 0x12f   :  { %v1117_v18 = vld [vmem:[%s4887_s3 + $0xe0] sm:$0xff] }
 0x130   :  { %v3478_v31 = vpop.eup %3477  ;;  %v4120_v35 = vadd.f32 %v597_v24, %v596_v19  ;;  %v4257_v19 = vpack.c.bf16 %v1117_v18, %v1113_v16  ;;  %v1122_v24 = vld [vmem:[%s4887_s3 + $0x108] sm:$0xff] }
 0x131   :  { %v593_v27 = vadd.f32 1.0, %v3478_v31  ;;  %v1126_v31 = vld [vmem:[%s4887_s3 + $0x128] sm:$0xff] }
 0x132   :  { %3479 = vtanh.f32 %v4120_v35 }
 0x133   :  { %3481 = vrcp.f32 %v593_v27  ;;  %v1121_v27 = vld [vmem:[%s4887_s3 + $0x100] sm:$0xff] }
 0x13c   :  { %v3480_v38 = vpop.eup %3479 }
 0x13d   :  { %v3482_v39 = vpop.eup %3481 }
 0x13e   :  { %v4123_v40 = vmul.f32 %v3482_v39, %v3480_v38  ;;  %v1125_v38 = vld [vmem:[%s4887_s3 + $0x120] sm:$0xff] }
 0x13f   :  { %v4275_v39 = vpack.c.bf16 %v1125_v38, %v1121_v27 }
 0x140   :  { %736 = vmatmul.mubr.f32.vlgmr.msra.gmra.mrb[2].mxu0 %v4123_v40  ;;  %807 = vmatmul.mubr.f32.vlgmr.msra.gmra.mrb[2].mxu1 %v4123_v40 }
 0x141   :  { %2982 = vmatpush1.bf16.msra.mxu0 %v3691_v21  ;;  %3014 = vmatpush1.bf16.msra.mxu1 %v3933_v29 }
 0x142   :  { %2984 = vmatprep.subr.bf16.mxu0 %v3694_v22  ;;  %3016 = vmatprep.subr.bf16.mxu1 %v3936_v30 }
 0x143   :  { %976 = vmatprep.mubr.f32.mxu0 %v3595_v3  ;;  %1047 = vmatprep.mubr.f32.mxu1 %v3595_v3 }
 0x145   :  { %2986 = vmatpush1.bf16.msra.mxu0 %v3717_v28  ;;  %3018 = vmatpush1.bf16.msra.mxu1 %v3957_v36 }
 0x146   :  { %2988 = vmatprep.subr.bf16.mxu0 %v3729_v32  ;;  %3020 = vmatprep.subr.bf16.mxu1 %v3961_v37 }
 0x149   :  { %2990 = vmatpush1.bf16.msra.mxu0 %v3758_v42  ;;  %3022 = vmatpush1.bf16.msra.mxu1 %v3981_v43 }
 0x14a   :  { %2992 = vmatprep.subr.bf16.mxu0 %v3770_v46  ;;  %3024 = vmatprep.subr.bf16.mxu1 %v3984_v44 }
 0x14d   :  { %2994 = vmatpush1.bf16.msra.mxu0 %v3793_v54  ;;  %3026 = vmatpush1.bf16.msra.mxu1 %v4003_v50 }
 0x14e   :  { %2996 = vmatprep.subr.bf16.mxu0 %v3796_v55  ;;  %3028 = vmatprep.subr.bf16.mxu1 %v4006_v51 }
 0x151   :  { %2998 = vmatpush1.bf16.msra.mxu0 %v3820_v61  ;;  %3030 = vmatpush1.bf16.msra.mxu1 %v4025_v58 }
 0x152   :  { %3000 = vmatprep.subr.bf16.mxu0 %v3823_v62  ;;  %3032 = vmatprep.subr.bf16.mxu1 %v4028_v59 }
 0x155   :  { %3002 = vmatpush1.bf16.msra.mxu0 %v3851_v5  ;;  %3034 = vmatpush1.bf16.msra.mxu1 %v4043_v1 }
 0x156   :  { %3004 = vmatprep.subr.bf16.mxu0 %v3854_v6  ;;  %3036 = vmatprep.subr.bf16.mxu1 %v4046_v2 }
 0x159   :  { %3006 = vmatpush1.bf16.msra.mxu0 %v3880_v12  ;;  %3038 = vmatpush1.bf16.msra.mxu1 %v4061_v10 }
 0x15a   :  { %3008 = vmatprep.subr.bf16.mxu0 %v3883_v13  ;;  %3040 = vmatprep.subr.bf16.mxu1 %v4064_v11 }
 0x15d   :  { %3010 = vmatpush1.bf16.msra.mxu0 %v3908_v20  ;;  %3042 = vmatpush1.bf16.msra.mxu1 %v4073_v17 }
 0x15e   :  { %3076 = vmatprep.subr.bf16.mxu1 %v3911_v23 }
 0x213   :  { %v737_v21 = vpop.f32.mrb[2].mxu0  ;;  %v808_v22 = vpop.f32.mrb[2].mxu1 }
 0x214   :  { %v3399_v28 = vadd.f32 %v737_v21, %v4106_v33  ;;  %v739_v32 = vpop.f32.mrb[3].mxu0  ;;  %v810_v42 = vpop.f32.mrb[3].mxu1  ;;  %v3415_v5 = vadd.f32 %v808_v22, %v4114_v60  ;;  %v1130_v21 = vld [vmem:[%s4887_s3 + $0x148] sm:$0xff] }
 0x215   :  { %v3400_v46 = vadd.f32 %v739_v32, %v4108_v34  ;;  %v3416_v61 = vadd.f32 %v810_v42, %v4116_v15  ;;  %v1134_v22 = vld [vmem:[%s4887_s3 + $0x168] sm:$0xff]  ;;  %v1133_v42 = vld [vmem:[%s4887_s3 + $0x160] sm:$0xff] }
 0x216   :  { %v2737_v54 = vmul.f32 -1.442695, %v3399_v28  ;;  %v1129_v28 = vld [vmem:[%s4887_s3 + $0x140] sm:$0xff]  ;;  %v4288_v32 = vpack.c.bf16 %v1134_v22, %v1130_v21  ;;  %v1337_v21 = vld [vmem:[%s4887_s3 + $0x38] sm:$0xff] }
 0x217   :  { %v2738_v55 = vmul.f32 -1.442695, %v3400_v46  ;;  %v2739_v62 = vmul.f32 -1.442695, %v3416_v61  ;;  %v1138_v46 = vld [vmem:[%s4887_s3 + $0x188] sm:$0xff] }
 0x218   :  { %3483 = vpow2.f32 %v2737_v54  ;;  %v1142_v54 = vld [vmem:[%s4887_s3 + $0x1a8] sm:$0xff] }
 0x219   :  { %3485 = vpow2.f32 %v2738_v55  ;;  %v4299_v55 = vpack.c.bf16 %v1133_v42, %v1129_v28  ;;  %v4301_v61 = vpack.c.bf16 %v1142_v54, %v1138_v46  ;;  %v1332_v28 = vld [vmem:[%s4887_s3 + $0x10] sm:$0xff]  ;;  %v1341_v54 = vld [vmem:[%s4887_s3 + $0x58] sm:$0xff] }
 0x21a   :  { %3487 = vpow2.f32 %v2739_v62  ;;  %v1137_v62 = vld [vmem:[%s4887_s3 + $0x180] sm:$0xff]  ;;  %v1336_v42 = vld [vmem:[%s4887_s3 + $0x30] sm:$0xff] }
 0x21b   :  { %3489 = vtanh.f32 %v3415_v5  ;;  %v1141_v5 = vld [vmem:[%s4887_s3 + $0x1a0] sm:$0xff]  ;;  %v4378_v46 = vpack.c.bf16 %v1336_v42, %v1332_v28  ;;  %v1380_v28 = vld [vmem:[%s4887_s3 + $0x190] sm:$0xff] }
 0x21c   :  { %v1384_v42 = vld [vmem:[%s4887_s3 + $0x1b0] sm:$0xff] }
 0x222   :  { %v3484_v6 = vpop.eup %3483 }
 0x223   :  { %v3486_v12 = vpop.eup %3485  ;;  %v820_v13 = vadd.f32 1.0, %v3484_v6  ;;  %v1146_v6 = vld [vmem:[%s4887_s3 + $0x1c8] sm:$0xff] }
 0x224   :  { %v826_v20 = vadd.f32 1.0, %v3486_v12  ;;  %v3488_v23 = vpop.eup %3487  ;;  %v1150_v12 = vld [vmem:[%s4887_s3 + $0x1e8] sm:$0xff] }
 0x225   :  { %3491 = vrcp.f32 %v820_v13  ;;  %v3490_v41 = vpop.eup %3489  ;;  %v833_v49 = vadd.f32 1.0, %v3488_v23  ;;  %v4317_v13 = vpack.c.bf16 %v1141_v5, %v1137_v62  ;;  %v1145_v23 = vld [vmem:[%s4887_s3 + $0x1c0] sm:$0xff]  ;;  %v1345_v62 = vld [vmem:[%s4887_s3 + $0x78] sm:$0xff] }
 0x226   :  { %3493 = vrcp.f32 %v826_v20  ;;  %v4320_v20 = vpack.c.bf16 %v1150_v12, %v1146_v6  ;;  %v4388_v5 = vpack.c.bf16 %v1345_v62, %v1341_v54  ;;  %v1340_v6 = vld [vmem:[%s4887_s3 + $0x50] sm:$0xff]  ;;  %v1389_v54 = vld [vmem:[%s4887_s3 + $0x1d8] sm:$0xff] }
 0x227   :  { %3495 = vrcp.f32 %v833_v49  ;;  %v1344_v12 = vld [vmem:[%s4887_s3 + $0x70] sm:$0xff]  ;;  %v1393_v62 = vld [vmem:[%s4887_s3 + $0x1f8] sm:$0xff] }
 0x22f   :  { %v3492_v45 = vpop.eup %3491 }
 0x230   :  { %v3494_v47 = vpop.eup %3493  ;;  %v837_v48 = vmul.f32 %v3492_v45, %v3490_v41  ;;  %v1149_v41 = vld [vmem:[%s4887_s3 + $0x1e0] sm:$0xff] }
 0x231   :  { %v836_v52 = vmul.f32 %v3494_v47, %v4120_v35  ;;  %v3496_v56 = vpop.eup %3495  ;;  %v4267_v35 = vpack.c.bf16 %v1126_v31, %v1122_v24  ;;  %v4329_v45 = vpack.c.bf16 %v1149_v41, %v1145_v23  ;;  %v4396_v23 = vpack.c.bf16 %v1344_v12, %v1340_v6  ;;  %v1349_v41 = vld [vmem:[%s4887_s3 + $0x98] sm:$0xff] }
 0x232   :  { %v4492_v6 = vpack.c.bf16 %v1384_v42, %v1380_v28  ;;  %v4495_v12 = vpack.c.bf16 %v1393_v62, %v1389_v54 }
 0x233   :  { %v4165_v53 = vadd.f32 %v837_v48, %v836_v52 }
 0x235   :  { %3497 = vtanh.f32 %v4165_v53 }
 0x23f   :  { %v3498_v57 = vpop.eup %3497 }
 0x240   :  { %v4168_v63 = vmul.f32 %v3498_v57, %v3496_v56 }
 0x242   :  { %977 = vmatmul.mubr.f32.vlgmr.msra.gmra.mrb[4].mxu0 %v4168_v63  ;;  %1048 = vmatmul.mubr.f32.vlgmr.msra.gmra.mrb[4].mxu1 %v4168_v63 }
 0x243   :  { %3078 = vmatpush1.bf16.msra.mxu1 %v3933_v29  ;;  %1217 = vmatprep.mubr.f32.mxu0 %v3595_v3  ;;  %v1090_v29 = vld [vmem:[%s4887_s3 + $0x8] sm:$0xff] }
 0x244   :  { %3080 = vmatprep.subr.bf16.mxu1 %v3936_v30  ;;  %1288 = vmatprep.mubr.f32.mxu1 %v3595_v3  ;;  %v1094_v30 = vld [vmem:[%s4887_s3 + $0x28] sm:$0xff] }
 0x247   :  { %3082 = vmatpush1.bf16.msra.mxu1 %v3957_v36  ;;  %v4195_v36 = vpack.c.bf16 %v1094_v30, %v1090_v29 }
 0x248   :  { %3084 = vmatprep.subr.bf16.mxu1 %v3961_v37  ;;  %v1089_v37 = vld [vmem:[%s4887_s3] sm:$0xff] }
 0x249   :  { %3044 = vmatprep.subr.bf16.mxu0 %v4195_v36 }
 0x24b   :  { %3086 = vmatpush1.bf16.msra.mxu1 %v3981_v43  ;;  %v1093_v43 = vld [vmem:[%s4887_s3 + $0x20] sm:$0xff] }
 0x24c   :  { %3088 = vmatprep.subr.bf16.mxu1 %v3984_v44  ;;  %v4203_v44 = vpack.c.bf16 %v1093_v43, %v1089_v37 }
 0x24e   :  { %3046 = vmatpush1.bf16.msra.mxu0 %v4203_v44 }
 0x24f   :  { %3090 = vmatpush1.bf16.msra.mxu1 %v4003_v50  ;;  %v1098_v50 = vld [vmem:[%s4887_s3 + $0x48] sm:$0xff] }
 0x250   :  { %3092 = vmatprep.subr.bf16.mxu1 %v4006_v51  ;;  %v1102_v51 = vld [vmem:[%s4887_s3 + $0x68] sm:$0xff] }
 0x253   :  { %3094 = vmatpush1.bf16.msra.mxu1 %v4025_v58  ;;  %v4213_v58 = vpack.c.bf16 %v1102_v51, %v1098_v50 }
 0x254   :  { %3096 = vmatprep.subr.bf16.mxu1 %v4028_v59  ;;  %v1097_v59 = vld [vmem:[%s4887_s3 + $0x40] sm:$0xff] }
 0x255   :  { %3048 = vmatprep.subr.bf16.mxu0 %v4213_v58 }
 0x257   :  { %3098 = vmatpush1.bf16.msra.mxu1 %v4043_v1  ;;  %v1101_v1 = vld [vmem:[%s4887_s3 + $0x60] sm:$0xff] }
 0x258   :  { %3100 = vmatprep.subr.bf16.mxu1 %v4046_v2  ;;  %v4221_v2 = vpack.c.bf16 %v1101_v1, %v1097_v59 }
 0x25a   :  { %3050 = vmatpush1.bf16.msra.mxu0 %v4221_v2 }
 0x25b   :  { %3102 = vmatpush1.bf16.msra.mxu1 %v4061_v10  ;;  %v1106_v10 = vld [vmem:[%s4887_s3 + $0x88] sm:$0xff] }
 0x25c   :  { %3104 = vmatprep.subr.bf16.mxu1 %v4064_v11  ;;  %v1110_v11 = vld [vmem:[%s4887_s3 + $0xa8] sm:$0xff] }
 0x25f   :  { %3106 = vmatpush1.bf16.msra.mxu1 %v4073_v17  ;;  %v4231_v17 = vpack.c.bf16 %v1110_v11, %v1106_v10 }
 0x261   :  { %3052 = vmatprep.subr.bf16.mxu0 %v4231_v17 }
 0x262   :  { %3054 = vmatpush1.bf16.msra.mxu0 %v4239_v7 }
 0x263   :  { %3056 = vmatprep.subr.bf16.mxu0 %v4249_v14 }
 0x266   :  { %3058 = vmatpush1.bf16.msra.mxu0 %v4257_v19 }
 0x267   :  { %3060 = vmatprep.subr.bf16.mxu0 %v4267_v35 }
 0x26a   :  { %3062 = vmatpush1.bf16.msra.mxu0 %v4275_v39 }
 0x26b   :  { %3064 = vmatprep.subr.bf16.mxu0 %v4288_v32 }
 0x26e   :  { %3066 = vmatpush1.bf16.msra.mxu0 %v4299_v55 }
 0x26f   :  { %3068 = vmatprep.subr.bf16.mxu0 %v4301_v61 }
 0x272   :  { %3070 = vmatpush1.bf16.msra.mxu0 %v4317_v13 }
 0x273   :  { %3072 = vmatprep.subr.bf16.mxu0 %v4320_v20 }
 0x276   :  { %3074 = vmatpush1.bf16.msra.mxu0 %v4329_v45 }
 0x277   :  { %3108 = vmatprep.subr.bf16.mxu0 %v4195_v36 }
 0x315   :  { %v978_v47 = vpop.f32.mrb[4].mxu0  ;;  %v1049_v48 = vpop.f32.mrb[4].mxu1 }
 0x316   :  { %v3401_v49 = vadd.f32 %v978_v47, %v4106_v33  ;;  %v980_v52 = vpop.f32.mrb[5].mxu0  ;;  %v1051_v56 = vpop.f32.mrb[5].mxu1  ;;  %v3417_v50 = vadd.f32 %v1049_v48, %v4114_v60  ;;  %v1353_v47 = vld [vmem:[%s4887_s3 + $0xb8] sm:$0xff] }
 0x317   :  { %v3402_v57 = vadd.f32 %v980_v52, %v4108_v34  ;;  %v3418_v37 = vadd.f32 %v1051_v56, %v4116_v15  ;;  %v4406_v48 = vpack.c.bf16 %v1353_v47, %v1349_v41  ;;  %v1352_v52 = vld [vmem:[%s4887_s3 + $0xb0] sm:$0xff] }
 0x318   :  { %v2740_v29 = vmul.f32 -1.442695, %v3401_v49  ;;  %v1348_v49 = vld [vmem:[%s4887_s3 + $0x90] sm:$0xff] }
 0x319   :  { %v2741_v30 = vmul.f32 -1.442695, %v3402_v57  ;;  %v2742_v43 = vmul.f32 -1.442695, %v3418_v37  ;;  %v4414_v56 = vpack.c.bf16 %v1352_v52, %v1348_v49  ;;  %v1357_v57 = vld [vmem:[%s4887_s3 + $0xd8] sm:$0xff]  ;;  %v1356_v37 = vld [vmem:[%s4887_s3 + $0xd0] sm:$0xff] }
 0x31a   :  { %3499 = vpow2.f32 %v2740_v29  ;;  %v1361_v29 = vld [vmem:[%s4887_s3 + $0xf8] sm:$0xff]  ;;  %v1388_v41 = vld [vmem:[%s4887_s3 + $0x1d0] sm:$0xff] }
 0x31b   :  { %3501 = vpow2.f32 %v2741_v30  ;;  %v4424_v30 = vpack.c.bf16 %v1361_v29, %v1357_v57  ;;  %v1392_v47 = vld [vmem:[%s4887_s3 + $0x1f0] sm:$0xff] }
 0x31c   :  { %3503 = vpow2.f32 %v2742_v43  ;;  %v1360_v43 = vld [vmem:[%s4887_s3 + $0xf0] sm:$0xff]  ;;  %v4504_v49 = vpack.c.bf16 %v1392_v47, %v1388_v41 }
 0x31d   :  { %3505 = vtanh.f32 %v3417_v50  ;;  %v4432_v50 = vpack.c.bf16 %v1360_v43, %v1356_v37 }
 0x324   :  { %v3500_v51 = vpop.eup %3499 }
 0x325   :  { %v3502_v59 = vpop.eup %3501  ;;  %v1061_v1 = vadd.f32 1.0, %v3500_v51  ;;  %v1365_v51 = vld [vmem:[%s4887_s3 + $0x118] sm:$0xff] }
 0x326   :  { %v1067_v10 = vadd.f32 1.0, %v3502_v59  ;;  %v3504_v11 = vpop.eup %3503  ;;  %v1369_v59 = vld [vmem:[%s4887_s3 + $0x138] sm:$0xff] }
 0x327   :  { %3507 = vrcp.f32 %v1061_v1  ;;  %v3506_v0 = vpop.eup %3505  ;;  %v1074_v16 = vadd.f32 1.0, %v3504_v11  ;;  %v4442_v1 = vpack.c.bf16 %v1369_v59, %v1365_v51  ;;  %v1368_v11 = vld [vmem:[%s4887_s3 + $0x130] sm:$0xff] }
 0x328   :  { %3509 = vrcp.f32 %v1067_v10  ;;  %v1364_v10 = vld [vmem:[%s4887_s3 + $0x110] sm:$0xff] }
 0x329   :  { %3511 = vrcp.f32 %v1074_v16 }
 0x331   :  { %v3508_v4 = vpop.eup %3507 }
 0x332   :  { %v3510_v8 = vpop.eup %3509  ;;  %v1078_v9 = vmul.f32 %v3508_v4, %v3506_v0  ;;  %v4450_v0 = vpack.c.bf16 %v1368_v11, %v1364_v10  ;;  %v1373_v4 = vld [vmem:[%s4887_s3 + $0x158] sm:$0xff] }
 0x333   :  { %v1077_v18 = vmul.f32 %v3510_v8, %v4165_v53  ;;  %v3512_v31 = vpop.eup %3511  ;;  %v1333_v53 = vld [vmem:[%s4887_s3 + $0x18] sm:$0xff] }
 0x334   :  { %v4370_v22 = vpack.c.bf16 %v1337_v21, %v1333_v53  ;;  %v1377_v8 = vld [vmem:[%s4887_s3 + $0x178] sm:$0xff] }
 0x335   :  { %v4339_v24 = vadd.f32 %v1078_v9, %v1077_v18  ;;  %v1372_v9 = vld [vmem:[%s4887_s3 + $0x150] sm:$0xff]  ;;  %v4463_v16 = vpack.c.bf16 %v1377_v8, %v1373_v4 }
 0x336   :  { %3140 = vmatprep.subr.bf16.mxu1 %v4370_v22  ;;  %v1376_v18 = vld [vmem:[%s4887_s3 + $0x170] sm:$0xff] }
 0x337   :  { %3513 = vtanh.f32 %v4339_v24  ;;  %v4474_v53 = vpack.c.bf16 %v1376_v18, %v1372_v9 }
 0x341   :  { %v3514_v27 = vpop.eup %3513 }
 0x342   :  { %v4342_v38 = vmul.f32 %v3514_v27, %v3512_v31  ;;  %v1381_v31 = vld [vmem:[%s4887_s3 + $0x198] sm:$0xff] }
 0x343   :  { %v1385_v27 = vld [vmem:[%s4887_s3 + $0x1b8] sm:$0xff] }
 0x344   :  { %1218 = vmatmul.mubr.f32.vlgmr.msra.gmra.mrb[6].mxu0 %v4342_v38  ;;  %1289 = vmatmul.mubr.f32.vlgmr.msra.gmra.mrb[6].mxu1 %v4342_v38  ;;  %v4476_v21 = vpack.c.bf16 %v1385_v27, %v1381_v31 }
 0x345   :  { %3110 = vmatpush1.bf16.msra.mxu0 %v4203_v44  ;;  %1458 = vmatprep.mubr.f32.mxu0 %v3595_v3 }
 0x346   :  { %3112 = vmatprep.subr.bf16.mxu0 %v4213_v58  ;;  %1529 = vmatprep.mubr.f32.mxu1 %v3595_v3 }
 0x347   :  { %3142 = vmatpush1.bf16.msra.mxu1 %v4378_v46 }
 0x348   :  { %3144 = vmatprep.subr.bf16.mxu1 %v4388_v5 }
 0x349   :  { %3114 = vmatpush1.bf16.msra.mxu0 %v4221_v2 }
 0x34a   :  { %3116 = vmatprep.subr.bf16.mxu0 %v4231_v17 }
 0x34b   :  { %3146 = vmatpush1.bf16.msra.mxu1 %v4396_v23 }
 0x34c   :  { %3148 = vmatprep.subr.bf16.mxu1 %v4406_v48 }
 0x34d   :  { %3118 = vmatpush1.bf16.msra.mxu0 %v4239_v7 }
 0x34e   :  { %3120 = vmatprep.subr.bf16.mxu0 %v4249_v14 }
 0x34f   :  { %3150 = vmatpush1.bf16.msra.mxu1 %v4414_v56 }
 0x350   :  { %3152 = vmatprep.subr.bf16.mxu1 %v4424_v30 }
 0x351   :  { %3122 = vmatpush1.bf16.msra.mxu0 %v4257_v19 }
 0x352   :  { %3124 = vmatprep.subr.bf16.mxu0 %v4267_v35 }
 0x353   :  { %3154 = vmatpush1.bf16.msra.mxu1 %v4432_v50 }
 0x354   :  { %3156 = vmatprep.subr.bf16.mxu1 %v4442_v1 }
 0x355   :  { %3126 = vmatpush1.bf16.msra.mxu0 %v4275_v39 }
 0x356   :  { %3128 = vmatprep.subr.bf16.mxu0 %v4288_v32 }
 0x357   :  { %3158 = vmatpush1.bf16.msra.mxu1 %v4450_v0 }
 0x358   :  { %3160 = vmatprep.subr.bf16.mxu1 %v4463_v16 }
 0x359   :  { %3130 = vmatpush1.bf16.msra.mxu0 %v4299_v55 }
 0x35a   :  { %3132 = vmatprep.subr.bf16.mxu0 %v4301_v61 }
 0x35b   :  { %3162 = vmatpush1.bf16.msra.mxu1 %v4474_v53 }
 0x35c   :  { %3164 = vmatprep.subr.bf16.mxu1 %v4476_v21 }
 0x35d   :  { %3134 = vmatpush1.bf16.msra.mxu0 %v4317_v13 }
 0x35e   :  { %3136 = vmatprep.subr.bf16.mxu0 %v4320_v20 }
 0x35f   :  { %3166 = vmatpush1.bf16.msra.mxu1 %v4492_v6 }
 0x360   :  { %3168 = vmatprep.subr.bf16.mxu1 %v4495_v12 }
 0x361   :  { %3138 = vmatpush1.bf16.msra.mxu0 %v4329_v45 }
 0x362   :  { %3172 = vmatprep.subr.bf16.mxu0 %v4195_v36 }
 0x363   :  { %3170 = vmatpush1.bf16.msra.mxu1 %v4504_v49 }
 0x364   :  { %3204 = vmatprep.subr.bf16.mxu1 %v4370_v22 }
 0x417   :  { %v1219_v52 = vpop.f32.mrb[6].mxu0  ;;  %v1290_v57 = vpop.f32.mrb[6].mxu1 }
 0x418   :  { %v3403_v29 = vadd.f32 %v1219_v52, %v4106_v33  ;;  %v1221_v37 = vpop.f32.mrb[7].mxu0  ;;  %v1292_v43 = vpop.f32.mrb[7].mxu1  ;;  %v3419_v8 = vadd.f32 %v1290_v57, %v4114_v60  ;;  %v3596_v57 = vmov 1983009808  }
 0x419   :  { %v3404_v51 = vadd.f32 %v1221_v37, %v4108_v34  ;;  %v3420_v11 = vadd.f32 %v1292_v43, %v4116_v15  ;;  %v2302_v37 = vunpack.c.l.s4 %v3596_v57 }
 0x41a   :  { %v2743_v59 = vmul.f32 -1.442695, %v3403_v29 }
 0x41b   :  { %v2744_v10 = vmul.f32 -1.442695, %v3404_v51  ;;  %v2745_v4 = vmul.f32 -1.442695, %v3420_v11  ;;  %v2303_v43 = vunpack.c.0.s8 %v2302_v37 }
 0x41c   :  { %3515 = vpow2.f32 %v2743_v59 }
 0x41d   :  { %3517 = vpow2.f32 %v2744_v10  ;;  %v2299_v10 = vcombine.low %v4123_v40, %v4342_v38  ;;  %v4520_v11 = vsub.s32 %v2303_v43, %v4096_v25 }
 0x41e   :  { %3519 = vpow2.f32 %v2745_v4 }
 0x41f   :  { %3521 = vtanh.f32 %v3419_v8 }
 0x426   :  { %v3516_v9 = vpop.eup %3515 }
 0x427   :  { %v3518_v18 = vpop.eup %3517  ;;  %v1302_v31 = vadd.f32 1.0, %v3516_v9 }
 0x428   :  { %v1308_v27 = vadd.f32 1.0, %v3518_v18  ;;  %v3520_v28 = vpop.eup %3519  ;;  %v4529_v18 = vrot.slane %v2299_v10, %v4520_v11 }
 0x429   :  { %3523 = vrcp.f32 %v1302_v31  ;;  %v3522_v42 = vpop.eup %3521  ;;  %v1315_v47 = vadd.f32 1.0, %v3520_v28 }
 0x42a   :  { %3525 = vrcp.f32 %v1308_v27 }
 0x42b   :  { %3527 = vrcp.f32 %v1315_v47 }
 0x433   :  { %v3524_v54 = vpop.eup %3523 }
 0x434   :  { %v3526_v62 = vpop.eup %3525  ;;  %v1319_v41 = vmul.f32 %v3524_v54, %v3522_v42 }
 0x435   :  { %v1318_v52 = vmul.f32 %v3526_v62, %v4339_v24  ;;  %v3528_v51 = vpop.eup %3527  ;;  %v2300_v24 = vcombine.high %v4123_v40, %v4342_v38 }
 0x437   :  { %v4514_v29 = vadd.f32 %v1319_v41, %v1318_v52  ;;  %v4537_v40 = vrot.slane %v2300_v24, %v4520_v11 }
 0x439   :  { %3529 = vtanh.f32 %v4514_v29 }
 0x443   :  { %v3530_v59 = vpop.eup %3529 }
 0x444   :  { %v1322_v4 = vmul.f32 %v3530_v59, %v3528_v51 }
 0x446   :  { %1459 = vmatmul.mubr.f32.vlgmr.msra.gmra.mrb[8].mxu0 %v1322_v4  ;;  %1530 = vmatmul.mubr.f32.vlgmr.msra.gmra.mrb[8].mxu1 %v1322_v4  ;;  %v2315_v8 = vcombine.low %v4168_v63, %v1322_v4  ;;  %v2316_v9 = vcombine.high %v4168_v63, %v1322_v4 }
 0x447   :  { %3174 = vmatpush1.bf16.msra.mxu0 %v4203_v44  ;;  %3206 = vmatpush1.bf16.msra.mxu1 %v4378_v46 }
 0x448   :  { %3176 = vmatprep.subr.bf16.mxu0 %v4213_v58  ;;  %3208 = vmatprep.subr.bf16.mxu1 %v4388_v5  ;;  %v4534_v31 = vrot.slane %v2315_v8, %v4520_v11  ;;  %v4540_v38 = vrot.slane %v2316_v9, %v4520_v11 }
 0x449   :  { %1699 = vmatprep.mubr.f32.mxu0 %v3595_v3  ;;  %1770 = vmatprep.mubr.f32.mxu1 %v3595_v3 }
 0x44a   :  { %v2363_v63 = vcombine.low %v4529_v18, %v4534_v31  ;;  %v2364_v27 = vcombine.high %v4529_v18, %v4534_v31  ;;  %v2379_v28 = vcombine.low %v4537_v40, %v4540_v38  ;;  %v2380_v42 = vcombine.high %v4537_v40, %v4540_v38 }
 0x44b   :  { %3178 = vmatpush1.bf16.msra.mxu0 %v4221_v2  ;;  %3210 = vmatpush1.bf16.msra.mxu1 %v4396_v23 }
 0x44c   :  { %3180 = vmatprep.subr.bf16.mxu0 %v4231_v17  ;;  %3212 = vmatprep.subr.bf16.mxu1 %v4406_v48 }
 0x44f   :  { %3182 = vmatpush1.bf16.msra.mxu0 %v4239_v7  ;;  %3214 = vmatpush1.bf16.msra.mxu1 %v4414_v56 }
 0x450   :  { %3184 = vmatprep.subr.bf16.mxu0 %v4249_v14  ;;  %3216 = vmatprep.subr.bf16.mxu1 %v4424_v30 }
 0x453   :  { %3186 = vmatpush1.bf16.msra.mxu0 %v4257_v19  ;;  %3218 = vmatpush1.bf16.msra.mxu1 %v4432_v50 }
 0x454   :  { %3188 = vmatprep.subr.bf16.mxu0 %v4267_v35  ;;  %3220 = vmatprep.subr.bf16.mxu1 %v4442_v1 }
 0x457   :  { %3190 = vmatpush1.bf16.msra.mxu0 %v4275_v39  ;;  %3222 = vmatpush1.bf16.msra.mxu1 %v4450_v0 }
 0x458   :  { %3192 = vmatprep.subr.bf16.mxu0 %v4288_v32  ;;  %3224 = vmatprep.subr.bf16.mxu1 %v4463_v16 }
 0x45b   :  { %3194 = vmatpush1.bf16.msra.mxu0 %v4299_v55  ;;  %3226 = vmatpush1.bf16.msra.mxu1 %v4474_v53 }
 0x45c   :  { %3196 = vmatprep.subr.bf16.mxu0 %v4301_v61  ;;  %3228 = vmatprep.subr.bf16.mxu1 %v4476_v21 }
 0x45f   :  { %3198 = vmatpush1.bf16.msra.mxu0 %v4317_v13  ;;  %3230 = vmatpush1.bf16.msra.mxu1 %v4492_v6 }
 0x460   :  { %3200 = vmatprep.subr.bf16.mxu0 %v4320_v20  ;;  %3232 = vmatprep.subr.bf16.mxu1 %v4495_v12 }
 0x463   :  { %3202 = vmatpush1.bf16.msra.mxu0 %v4329_v45  ;;  %3234 = vmatpush1.bf16.msra.mxu1 %v4504_v49 }
 0x464   :  { %3236 = vmatprep.subr.bf16.mxu0 %v4195_v36  ;;  %3268 = vmatprep.subr.bf16.mxu1 %v4370_v22 }
 0x519   :  { %v1460_v54 = vpop.f32.mrb[8].mxu0  ;;  %v1531_v62 = vpop.f32.mrb[8].mxu1 }
 0x51a   :  { %v3405_v41 = vadd.f32 %v1460_v54, %v4106_v33  ;;  %v1462_v47 = vpop.f32.mrb[9].mxu0  ;;  %v1533_v52 = vpop.f32.mrb[9].mxu1  ;;  %v3421_v10 = vadd.f32 %v1531_v62, %v4114_v60 }
 0x51b   :  { %v3406_v57 = vadd.f32 %v1462_v47, %v4108_v34  ;;  %v3422_v51 = vadd.f32 %v1533_v52, %v4116_v15 }
 0x51c   :  { %v2746_v37 = vmul.f32 -1.442695, %v3405_v41 }
 0x51d   :  { %v2747_v43 = vmul.f32 -1.442695, %v3406_v57  ;;  %v2748_v59 = vmul.f32 -1.442695, %v3422_v51 }
 0x51e   :  { %3531 = vpow2.f32 %v2746_v37 }
 0x51f   :  { %3533 = vpow2.f32 %v2747_v43 }
 0x520   :  { %3535 = vpow2.f32 %v2748_v59 }
 0x521   :  { %3537 = vtanh.f32 %v3421_v10 }
 0x528   :  { %v3532_v36 = vpop.eup %3531 }
 0x529   :  { %v3534_v4 = vpop.eup %3533  ;;  %v1543_v24 = vadd.f32 1.0, %v3532_v36 }
 0x52a   :  { %v1549_v8 = vadd.f32 1.0, %v3534_v4  ;;  %v3536_v9 = vpop.eup %3535 }
 0x52b   :  { %3539 = vrcp.f32 %v1543_v24  ;;  %v3538_v54 = vpop.eup %3537  ;;  %v1556_v37 = vadd.f32 1.0, %v3536_v9 }
 0x52c   :  { %3541 = vrcp.f32 %v1549_v8 }
 0x52d   :  { %3543 = vrcp.f32 %v1556_v37 }
 0x535   :  { %v3540_v47 = vpop.eup %3539 }
 0x536   :  { %v3542_v41 = vpop.eup %3541  ;;  %v1560_v57 = vmul.f32 %v3540_v47, %v3538_v54 }
 0x537   :  { %v1559_v43 = vmul.f32 %v3542_v41, %v4514_v29  ;;  %v3544_v62 = vpop.eup %3543 }
 0x539   :  { %v4585_v52 = vadd.f32 %v1560_v57, %v1559_v43  ;;  %v2073_v57 = vld [vmem:[%s4887_s3 + $0xa0] sm:$0xff]  ;;  %v2078_v43 = vld [vmem:[%s4887_s3 + $0xc8] sm:$0xff] }
 0x53b   :  { %3545 = vtanh.f32 %v4585_v52 }
 0x545   :  { %v3546_v51 = vpop.eup %3545 }
 0x546   :  { %v4588_v59 = vmul.f32 %v3546_v51, %v3544_v62  ;;  %v2077_v51 = vld [vmem:[%s4887_s3 + $0xc0] sm:$0xff] }
 0x548   :  { %1700 = vmatmul.mubr.f32.vlgmr.msra.gmra.mrb[10].mxu0 %v4588_v59  ;;  %1771 = vmatmul.mubr.f32.vlgmr.msra.gmra.mrb[10].mxu1 %v4588_v59 }
 0x549   :  { %3238 = vmatpush1.bf16.msra.mxu0 %v4203_v44  ;;  %3270 = vmatpush1.bf16.msra.mxu1 %v4378_v46 }
 0x54a   :  { %3240 = vmatprep.subr.bf16.mxu0 %v4213_v58  ;;  %3272 = vmatprep.subr.bf16.mxu1 %v4388_v5 }
 0x54b   :  { %1940 = vmatprep.mubr.f32.mxu0 %v3595_v3  ;;  %2011 = vmatprep.mubr.f32.mxu1 %v3595_v3 }
 0x54d   :  { %3242 = vmatpush1.bf16.msra.mxu0 %v4221_v2  ;;  %3274 = vmatpush1.bf16.msra.mxu1 %v4396_v23 }
 0x54e   :  { %3244 = vmatprep.subr.bf16.mxu0 %v4231_v17  ;;  %3276 = vmatprep.subr.bf16.mxu1 %v4406_v48 }
 0x551   :  { %3246 = vmatpush1.bf16.msra.mxu0 %v4239_v7  ;;  %3278 = vmatpush1.bf16.msra.mxu1 %v4414_v56 }
 0x552   :  { %3248 = vmatprep.subr.bf16.mxu0 %v4249_v14  ;;  %3280 = vmatprep.subr.bf16.mxu1 %v4424_v30 }
 0x555   :  { %3250 = vmatpush1.bf16.msra.mxu0 %v4257_v19  ;;  %3282 = vmatpush1.bf16.msra.mxu1 %v4432_v50 }
 0x556   :  { %3252 = vmatprep.subr.bf16.mxu0 %v4267_v35  ;;  %3284 = vmatprep.subr.bf16.mxu1 %v4442_v1 }
 0x559   :  { %3254 = vmatpush1.bf16.msra.mxu0 %v4275_v39  ;;  %3286 = vmatpush1.bf16.msra.mxu1 %v4450_v0 }
 0x55a   :  { %3256 = vmatprep.subr.bf16.mxu0 %v4288_v32  ;;  %3288 = vmatprep.subr.bf16.mxu1 %v4463_v16 }
 0x55d   :  { %3258 = vmatpush1.bf16.msra.mxu0 %v4299_v55  ;;  %3290 = vmatpush1.bf16.msra.mxu1 %v4474_v53 }
 0x55e   :  { %3260 = vmatprep.subr.bf16.mxu0 %v4301_v61  ;;  %3292 = vmatprep.subr.bf16.mxu1 %v4476_v21 }
 0x561   :  { %3262 = vmatpush1.bf16.msra.mxu0 %v4317_v13  ;;  %3294 = vmatpush1.bf16.msra.mxu1 %v4492_v6 }
 0x562   :  { %3264 = vmatprep.subr.bf16.mxu0 %v4320_v20  ;;  %3296 = vmatprep.subr.bf16.mxu1 %v4495_v12 }
 0x565   :  { %3266 = vmatpush1.bf16.msra.mxu0 %v4329_v45  ;;  %3298 = vmatpush1.bf16.msra.mxu1 %v4504_v49 }
 0x566   :  { %3332 = vmatprep.subr.bf16.mxu1 %v4370_v22 }
 0x61b   :  { %v1701_v44 = vpop.f32.mrb[10].mxu0  ;;  %v1772_v58 = vpop.f32.mrb[10].mxu1 }
 0x61c   :  { %v3407_v2 = vadd.f32 %v1701_v44, %v4106_v33  ;;  %v1703_v17 = vpop.f32.mrb[11].mxu0  ;;  %v1774_v7 = vpop.f32.mrb[11].mxu1  ;;  %v3423_v55 = vadd.f32 %v1772_v58, %v4114_v60  ;;  %v2081_v44 = vld [vmem:[%s4887_s3 + $0xe0] sm:$0xff] }
 0x61d   :  { %v3408_v14 = vadd.f32 %v1703_v17, %v4108_v34  ;;  %v3424_v39 = vadd.f32 %v1774_v7, %v4116_v15  ;;  %v3313_v58 = vpack.c.bf16 %v2081_v44, %v2077_v51  ;;  %v2090_v17 = vld [vmem:[%s4887_s3 + $0x128] sm:$0xff] }
 0x61e   :  { %v2749_v19 = vmul.f32 -1.442695, %v3407_v2  ;;  %v2086_v2 = vld [vmem:[%s4887_s3 + $0x108] sm:$0xff] }
 0x61f   :  { %v2750_v35 = vmul.f32 -1.442695, %v3408_v14  ;;  %v2751_v32 = vmul.f32 -1.442695, %v3424_v39  ;;  %v3315_v7 = vpack.c.bf16 %v2090_v17, %v2086_v2  ;;  %v2085_v14 = vld [vmem:[%s4887_s3 + $0x100] sm:$0xff]  ;;  %v2094_v39 = vld [vmem:[%s4887_s3 + $0x148] sm:$0xff] }
 0x620   :  { %3547 = vpow2.f32 %v2749_v19  ;;  %v2089_v19 = vld [vmem:[%s4887_s3 + $0x120] sm:$0xff] }
 0x621   :  { %3549 = vpow2.f32 %v2750_v35  ;;  %v3317_v35 = vpack.c.bf16 %v2089_v19, %v2085_v14 }
 0x622   :  { %3551 = vpow2.f32 %v2751_v32  ;;  %v2098_v32 = vld [vmem:[%s4887_s3 + $0x168] sm:$0xff] }
 0x623   :  { %3553 = vtanh.f32 %v3423_v55  ;;  %v2093_v55 = vld [vmem:[%s4887_s3 + $0x140] sm:$0xff] }
 0x62a   :  { %v3548_v61 = vpop.eup %3547 }
 0x62b   :  { %v3550_v13 = vpop.eup %3549  ;;  %v1784_v20 = vadd.f32 1.0, %v3548_v61  ;;  %v3319_v61 = vpack.c.bf16 %v2098_v32, %v2094_v39 }
 0x62c   :  { %v1790_v45 = vadd.f32 1.0, %v3550_v13  ;;  %v3552_v22 = vpop.eup %3551  ;;  %v2097_v13 = vld [vmem:[%s4887_s3 + $0x160] sm:$0xff] }
 0x62d   :  { %3555 = vrcp.f32 %v1784_v20  ;;  %v3554_v29 = vpop.eup %3553  ;;  %v1797_v24 = vadd.f32 1.0, %v3552_v22  ;;  %v2102_v20 = vld [vmem:[%s4887_s3 + $0x188] sm:$0xff]  ;;  %v3321_v22 = vpack.c.bf16 %v2097_v13, %v2093_v55 }
 0x62e   :  { %3557 = vrcp.f32 %v1790_v45  ;;  %v2106_v45 = vld [vmem:[%s4887_s3 + $0x1a8] sm:$0xff] }
 0x62f   :  { %3559 = vrcp.f32 %v1797_v24  ;;  %v2114_v24 = vld [vmem:[%s4887_s3 + $0x1e8] sm:$0xff] }
 0x637   :  { %v3556_v10 = vpop.eup %3555 }
 0x638   :  { %v3558_v36 = vpop.eup %3557  ;;  %v1801_v4 = vmul.f32 %v3556_v10, %v3554_v29  ;;  %v3323_v29 = vpack.c.bf16 %v2106_v45, %v2102_v20  ;;  %v2101_v10 = vld [vmem:[%s4887_s3 + $0x180] sm:$0xff] }
 0x639   :  { %v1800_v8 = vmul.f32 %v3558_v36, %v4585_v52  ;;  %v3560_v54 = vpop.eup %3559  ;;  %v2082_v52 = vld [vmem:[%s4887_s3 + $0xe8] sm:$0xff]  ;;  %v2105_v36 = vld [vmem:[%s4887_s3 + $0x1a0] sm:$0xff] }
 0x63a   :  { %v3311_v62 = vpack.c.bf16 %v2082_v52, %v2078_v43 }
 0x63b   :  { %v4630_v9 = vadd.f32 %v1801_v4, %v1800_v8  ;;  %v2110_v4 = vld [vmem:[%s4887_s3 + $0x1c8] sm:$0xff]  ;;  %v3325_v8 = vpack.c.bf16 %v2105_v36, %v2101_v10 }
 0x63d   :  { %3561 = vtanh.f32 %v4630_v9 }
 0x647   :  { %v3562_v47 = vpop.eup %3561 }
 0x648   :  { %v4633_v41 = vmul.f32 %v3562_v47, %v3560_v54  ;;  %v3327_v54 = vpack.c.bf16 %v2114_v24, %v2110_v4  ;;  %v2109_v47 = vld [vmem:[%s4887_s3 + $0x1c0] sm:$0xff] }
 0x64a   :  { %1941 = vmatmul.mubr.f32.vlgmr.msra.gmra.mrb[12].mxu0 %v4633_v41  ;;  %2012 = vmatmul.mubr.f32.vlgmr.msra.gmra.mrb[12].mxu1 %v4633_v41 }
 0x64b   :  { %3334 = vmatpush1.bf16.msra.mxu1 %v4378_v46  ;;  %2181 = vmatprep.mubr.f32.mxu0 %v3595_v3  ;;  %v2058_v46 = vld [vmem:[%s4887_s3 + $0x28] sm:$0xff] }
 0x64c   :  { %3336 = vmatprep.subr.bf16.mxu1 %v4388_v5  ;;  %2252 = vmatprep.mubr.f32.mxu1 %v3595_v3  ;;  %v2054_v3 = vld [vmem:[%s4887_s3 + $0x8] sm:$0xff] }
 0x64d   :  { %v3299_v5 = vpack.c.bf16 %v2058_v46, %v2054_v3  ;;  %v2113_v3 = vld [vmem:[%s4887_s3 + $0x1e0] sm:$0xff] }
 0x64e   :  { %v3329_v46 = vpack.c.bf16 %v2113_v3, %v2109_v47 }
 0x64f   :  { %3338 = vmatpush1.bf16.msra.mxu1 %v4396_v23  ;;  %v2053_v23 = vld [vmem:[%s4887_s3] sm:$0xff]  ;;  %3300 = vmatprep.subr.bf16.mxu0 %v3299_v5  ;;  %v3597_v5 = vmov 0  }
 0x650   :  { %3340 = vmatprep.subr.bf16.mxu1 %v4406_v48  ;;  %v2057_v48 = vld [vmem:[%s4887_s3 + $0x20] sm:$0xff]  ;;  %3464 = vset.pattern.permute.xlu0 %v3597_v5 }
 0x651   :  { %3465 = vset.pattern.permute.xlu1 %v3597_v5 }
 0x653   :  { %3342 = vmatpush1.bf16.msra.mxu1 %v4414_v56  ;;  %v3301_v56 = vpack.c.bf16 %v2057_v48, %v2053_v23  ;;  %v3598_v23 = vmov 1966171168  }
 0x654   :  { %3344 = vmatprep.subr.bf16.mxu1 %v4424_v30  ;;  %v2062_v30 = vld [vmem:[%s4887_s3 + $0x48] sm:$0xff]  ;;  %v2443_v48 = vunpack.c.l.s4 %v3598_v23 }
 0x655   :  { %3302 = vmatpush1.bf16.msra.mxu0 %v3301_v56  ;;  %v2440_v56 = vld [vmem:[%s4890_s1] sm:$0xff] }
 0x657   :  { %3346 = vmatpush1.bf16.msra.mxu1 %v4432_v50  ;;  %v2066_v50 = vld [vmem:[%s4887_s3 + $0x68] sm:$0xff] }
 0x658   :  { %3348 = vmatprep.subr.bf16.mxu1 %v4442_v1  ;;  %v3303_v1 = vpack.c.bf16 %v2066_v50, %v2062_v30  ;;  %v2444_v30 = vunpack.c.0.s8 %v2443_v48  ;;  %v2441_v50 = vcombine.high %v2440_v56, %v2440_v56 }
 0x65a   :  { %3304 = vmatprep.subr.bf16.mxu0 %v3303_v1  ;;  %v2447_v1 = vsub.s32 %v2444_v30, %v4096_v25 }
 0x65b   :  { %3350 = vmatpush1.bf16.msra.mxu1 %v4450_v0  ;;  %v2061_v0 = vld [vmem:[%s4887_s3 + $0x40] sm:$0xff] }
 0x65c   :  { %3352 = vmatprep.subr.bf16.mxu1 %v4463_v16  ;;  %v2065_v16 = vld [vmem:[%s4887_s3 + $0x60] sm:$0xff] }
 0x65f   :  { %3354 = vmatpush1.bf16.msra.mxu1 %v4474_v53  ;;  %v3305_v53 = vpack.c.bf16 %v2065_v16, %v2061_v0  ;;  %v2448_v0 = vrot.slane %v2440_v56, %v2447_v1  ;;  %v2455_v16 = vrot.slane %v2441_v50, %v2447_v1 }
 0x660   :  { %3356 = vmatprep.subr.bf16.mxu1 %v4476_v21  ;;  %v2070_v21 = vld [vmem:[%s4887_s3 + $0x88] sm:$0xff] }
 0x661   :  { %3306 = vmatpush1.bf16.msra.mxu0 %v3305_v53  ;;  %v2464_v53 = vrot.slane %v2448_v0, %v2447_v1 }
 0x663   :  { %3358 = vmatpush1.bf16.msra.mxu1 %v4492_v6  ;;  %v2074_v6 = vld [vmem:[%s4887_s3 + $0xa8] sm:$0xff] }
 0x664   :  { %3360 = vmatprep.subr.bf16.mxu1 %v4495_v12  ;;  %v3307_v12 = vpack.c.bf16 %v2074_v6, %v2070_v21  ;;  %v2456_v21 = vcombine.high %v2448_v0, %v2448_v0  ;;  %v2471_v6 = vrot.slane %v2455_v16, %v2447_v1 }
 0x666   :  { %3308 = vmatprep.subr.bf16.mxu0 %v3307_v12  ;;  %v2457_v12 = vcombine.high %v2455_v16, %v2455_v16  ;;  %v2509_v43 = vrot.slane %v2471_v6, %v4099_v26  ;;  %v2487_v52 = vcombine.high %v2471_v6, %v2471_v6 }
 0x667   :  { %3362 = vmatpush1.bf16.msra.mxu1 %v4504_v49  ;;  %v2069_v49 = vld [vmem:[%s4887_s3 + $0x80] sm:$0xff] }
 0x668   :  { %v3309_v37 = vpack.c.bf16 %v2073_v57, %v2069_v49  ;;  %v2493_v49 = vrot.slane %v2464_v53, %v4099_v26  ;;  %v2486_v57 = vcombine.high %v2464_v53, %v2464_v53  ;;  %vm2526_vm5 = vcmp.lt.s32.totalorder %v4096_v25, %v2509_v43  ;;  %v2580_v43 = vld [vmem:[%s4891_s5 + $0x10] sm:$0xff] }
 0x66a   :  { %3310 = vmatpush1.bf16.msra.mxu0 %v3309_v37  ;;  %v2478_v37 = vrot.slane %v2456_v21, %v2447_v1  ;;  %vm2522_vm1 = vcmp.lt.s32.totalorder %v4096_v25, %v2493_v49  ;;  %v2501_v51 = vrot.slane %v2486_v57, %v4099_v26  ;;  %v2578_v57 = vld [vmem:[%s4891_s5] sm:$0xff] }
 0x66b   :  { %3312 = vmatprep.subr.bf16.mxu0 %v3311_v62  ;;  %v2485_v62 = vrot.slane %v2457_v12, %v2447_v1  ;;  %v2530_v2 = vsel %vm2522_vm1, 1, %v3597_v5 }
 0x66c   :  { %v2497_v44 = vrot.slane %v2478_v37, %v4099_v26  ;;  %2539 = vperm.xlu0 %3464, %v2530_v2   ;;  %vm2524_vm2 = vcmp.lt.s32.totalorder %v4096_v25, %v2501_v51  ;;  %v2582_v51 = vld [vmem:[%s4891_s5 + $0x20] sm:$0xff]  ;;  %v2584_v2 = vld [vmem:[%s4891_s5 + $0x30] sm:$0xff] }
 0x66d   :  { %v2532_v14 = vsel %vm2524_vm2, 1, %v3597_v5  ;;  %v2489_v39 = vcombine.high %v2485_v62, %v2485_v62 }
 0x66e   :  { %3314 = vmatpush1.bf16.msra.mxu0 %v3313_v58  ;;  %v2488_v58 = vcombine.high %v2478_v37, %v2478_v37  ;;  %vm2523_vm3 = vcmp.lt.s32.totalorder %v4096_v25, %v2497_v44  ;;  %2545 = vperm.xlu1 %3465, %v2532_v14   ;;  %v2583_v44 = vld [vmem:[%s4891_s5 + $0x28] sm:$0xff]  ;;  %v2586_v14 = vld [vmem:[%s4891_s5 + $0x40] sm:$0xff] }
 0x66f   :  { %3316 = vmatprep.subr.bf16.mxu0 %v3315_v7  ;;  %v2513_v7 = vrot.slane %v2485_v62, %v4099_v26  ;;  %v2531_v19 = vsel %vm2523_vm3, 1, %v3597_v5  ;;  %v2521_v55 = vrot.slane %v2489_v39, %v4099_v26  ;;  %v2588_v39 = vld [vmem:[%s4891_s5 + $0x50] sm:$0xff] }
 0x670   :  { %v2505_v17 = vrot.slane %v2488_v58, %v4099_v26  ;;  %2542 = vperm.xlu0 %3464, %v2531_v19   ;;  %v3371_v58 = vpack.c.bf16 %v2583_v44, %v2582_v51  ;;  %v2587_v19 = vld [vmem:[%s4891_s5 + $0x48] sm:$0xff] }
 0x671   :  { %vm2527_vm6 = vcmp.lt.s32.totalorder %v4096_v25, %v2513_v7  ;;  %vm2529_vm8 = vcmp.lt.s32.totalorder %v4096_v25, %v2521_v55 }
 0x672   :  { %3318 = vmatpush1.bf16.msra.mxu0 %v3317_v35  ;;  %vm2525_vm4 = vcmp.lt.s32.totalorder %v4096_v25, %v2505_v17  ;;  %v2517_v35 = vrot.slane %v2487_v52, %v4099_v26  ;;  %v2535_v13 = vsel %vm2527_vm6, 1, %v3597_v5  ;;  %v2537_v45 = vsel %vm2529_vm8, 1, %v3597_v5  ;;  %v2581_v52 = vld [vmem:[%s4891_s5 + $0x18] sm:$0xff] }
 0x673   :  { %3320 = vmatprep.subr.bf16.mxu0 %v3319_v61  ;;  %v2533_v32 = vsel %vm2525_vm4, 1, %v3597_v5  ;;  %v2534_v61 = vsel %vm2526_vm5, 1, %v3597_v5  ;;  %v3367_v62 = vpack.c.bf16 %v2581_v52, %v2580_v43  ;;  %v2585_v17 = vld [vmem:[%s4891_s5 + $0x38] sm:$0xff] }
 0x674   :  { %2548 = vperm.xlu1 %3465, %v2533_v32   ;;  %vm2528_vm7 = vcmp.lt.s32.totalorder %v4096_v25, %v2517_v35  ;;  %2551 = vperm.xlu0 %3464, %v2534_v61   ;;  %v3375_v7 = vpack.c.bf16 %v2585_v17, %v2584_v2  ;;  %v3379_v35 = vpack.c.bf16 %v2587_v19, %v2586_v14  ;;  %v2589_v32 = vld [vmem:[%s4891_s5 + $0x58] sm:$0xff]  ;;  %v2590_v61 = vld [vmem:[%s4891_s5 + $0x60] sm:$0xff] }
 0x675   :  { %v2536_v20 = vsel %vm2528_vm7, 1, %v3597_v5  ;;  %v3383_v55 = vpack.c.bf16 %v2589_v32, %v2588_v39 }
 0x676   :  { %3322 = vmatpush1.bf16.msra.mxu0 %v3321_v22 }
 0x677   :  { %3324 = vmatprep.subr.bf16.mxu0 %v3323_v29 }
 0x678   :  { %2554 = vperm.xlu1 %3465, %v2535_v13   ;;  %2557 = vperm.xlu0 %3464, %v2536_v20   ;;  %v2591_v13 = vld [vmem:[%s4891_s5 + $0x68] sm:$0xff] }
 0x679   :  { %v3387_v20 = vpack.c.bf16 %v2591_v13, %v2590_v61 }
 0x67a   :  { %3326 = vmatpush1.bf16.msra.mxu0 %v3325_v8 }
 0x67b   :  { %3328 = vmatprep.subr.bf16.mxu0 %v3327_v54 }
 0x67c   :  { %2560 = vperm.xlu1 %3465, %v2537_v45   ;;  %v2592_v45 = vld [vmem:[%s4891_s5 + $0x70] sm:$0xff] }
 0x67e   :  { %3330 = vmatpush1.bf16.msra.mxu0 %v3329_v46 }
 0x6eb   :  { %v2540_v43 = vpop.permute.xlu0 %2539 }
 0x6ec   :  { %vm2562_vm9 = vcmp.eq.s32.totalorder %v2540_v43, 1 }
 0x6ed   :  { %v2546_v44 = vpop.permute.xlu1 %2545 }
 0x6ee   :  { %vm2564_vm10 = vcmp.eq.s32.totalorder %v2546_v44, 1 }
 0x6ef   :  { %v2543_v19 = vpop.permute.xlu0 %2542 }
 0x6f0   :  { %vm2563_vm11 = vcmp.eq.s32.totalorder %v2543_v19, 1 }
 0x71d   :  { %v1942_v22 = vpop.f32.mrb[12].mxu0  ;;  %v2013_v29 = vpop.f32.mrb[12].mxu1 }
 0x71e   :  { %v3409_v10 = vadd.f32 %v1942_v22, %v4106_v33  ;;  %v1944_v36 = vpop.f32.mrb[13].mxu0  ;;  %v2015_v4 = vpop.f32.mrb[13].mxu1  ;;  %v3425_v3 = vadd.f32 %v2013_v29, %v4114_v60  ;;  %v2593_v22 = vld [vmem:[%s4891_s5 + $0x78] sm:$0xff] }
 0x71f   :  { %v3410_v26 = vadd.f32 %v1944_v36, %v4108_v34  ;;  %v3426_v54 = vadd.f32 %v2015_v4, %v4116_v15  ;;  %v3391_v29 = vpack.c.bf16 %v2593_v22, %v2592_v45 }
 0x720   :  { %v2752_v24 = vmul.f32 -1.442695, %v3409_v10 }
 0x721   :  { %v2753_v8 = vmul.f32 -1.442695, %v3410_v26  ;;  %v2754_v47 = vmul.f32 -1.442695, %v3426_v54 }
 0x722   :  { %3563 = vpow2.f32 %v2752_v24 }
 0x723   :  { %3565 = vpow2.f32 %v2753_v8 }
 0x724   :  { %3567 = vpow2.f32 %v2754_v47 }
 0x725   :  { %3569 = vtanh.f32 %v3425_v3 }
 0x72c   :  { %v3564_v46 = vpop.eup %3563 }
 0x72d   :  { %v3566_v5 = vpop.eup %3565  ;;  %v2025_v23 = vadd.f32 1.0, %v3564_v46 }
 0x72e   :  { %v2031_v48 = vadd.f32 1.0, %v3566_v5  ;;  %v3568_v56 = vpop.eup %3567 }
 0x72f   :  { %3571 = vrcp.f32 %v2025_v23  ;;  %v3570_v30 = vpop.eup %3569  ;;  %v2038_v16 = vadd.f32 1.0, %v3568_v56 }
 0x730   :  { %3573 = vrcp.f32 %v2031_v48 }
 0x731   :  { %3575 = vrcp.f32 %v2038_v16 }
 0x739   :  { %v3572_v50 = vpop.eup %3571 }
 0x73a   :  { %v3574_v1 = vpop.eup %3573  ;;  %v2042_v0 = vmul.f32 %v3572_v50, %v3570_v30 }
 0x73b   :  { %v2041_v53 = vmul.f32 %v3574_v1, %v4630_v9  ;;  %v3576_v6 = vpop.eup %3575  ;;  %v2579_v9 = vld [vmem:[%s4891_s5 + $0x8] sm:$0xff] }
 0x73c   :  { %v3363_v37 = vpack.c.bf16 %v2579_v9, %v2578_v57 }
 0x73d   :  { %v4775_v21 = vadd.f32 %v2042_v0, %v2041_v53 }
 0x73e   :  { %3364 = vmatprep.subr.bf16.mxu0 %v3363_v37 }
 0x73f   :  { %3577 = vtanh.f32 %v4775_v21 }
 0x749   :  { %v3578_v12 = vpop.eup %3577 }
 0x74a   :  { %v4778_v49 = vmul.f32 %v3578_v12, %v3576_v6 }
 0x74c   :  { %2182 = vmatmul.mubr.f32.vlgmr.msra.gmra.mrb[14].mxu0 %v4778_v49  ;;  %2253 = vmatmul.mubr.f32.vlgmr.msra.gmra.mrb[14].mxu1 %v4778_v49  ;;  %v2331_v52 = vcombine.low %v4588_v59, %v4778_v49 }
 0x74d   :  { %3366 = vmatpush3.bf16.msra.mxu0 %v3363_v37 }
 0x74e   :  { %3368 = vmatprep.subr.bf16.mxu0 %v3367_v62  ;;  %v2339_v2 = vrot.slane %v2331_v52, %v4520_v11 }
 0x751   :  { %3370 = vmatpush3.bf16.msra.mxu0 %v3367_v62  ;;  %v2332_v62 = vcombine.high %v4588_v59, %v4778_v49 }
 0x752   :  { %3372 = vmatprep.subr.bf16.mxu0 %v3371_v58 }
 0x755   :  { %3374 = vmatpush3.bf16.msra.mxu0 %v3371_v58 }
 0x756   :  { %3376 = vmatprep.subr.bf16.mxu0 %v3375_v7 }
 0x759   :  { %3378 = vmatpush3.bf16.msra.mxu0 %v3375_v7  ;;  %v2346_v7 = vrot.slane %v2332_v62, %v4520_v11 }
 0x75a   :  { %3380 = vmatprep.subr.bf16.mxu0 %v3379_v35 }
 0x75d   :  { %3382 = vmatpush3.bf16.msra.mxu0 %v3379_v35 }
 0x75e   :  { %3384 = vmatprep.subr.bf16.mxu0 %v3383_v55 }
 0x761   :  { %3386 = vmatpush3.bf16.msra.mxu0 %v3383_v55 }
 0x762   :  { %3388 = vmatprep.subr.bf16.mxu0 %v3387_v20 }
 0x765   :  { %3390 = vmatpush3.bf16.msra.mxu0 %v3387_v20 }
 0x766   :  { %3392 = vmatprep.subr.bf16.mxu0 %v3391_v29 }
 0x769   :  { %3394 = vmatpush3.bf16.msra.mxu0 %v3391_v29 }
 0x81f   :  { %v2183_v10 = vpop.f32.mrb[14].mxu0  ;;  %v2254_v36 = vpop.f32.mrb[14].mxu1 }
 0x820   :  { %v3411_v4 = vadd.f32 %v2183_v10, %v4106_v33  ;;  %v2185_v26 = vpop.f32.mrb[15].mxu0  ;;  %v2256_v24 = vpop.f32.mrb[15].mxu1  ;;  %v3427_v5 = vadd.f32 %v2254_v36, %v4114_v60  ;;  %v3599_v60 = vmov 1934713408  }
 0x821   :  { %v3412_v8 = vadd.f32 %v2185_v26, %v4108_v34  ;;  %v3428_v3 = vadd.f32 %v2256_v24, %v4116_v15  ;;  %v2366_v6 = vunpack.c.l.s4 %v3599_v60 }
 0x822   :  { %v2755_v54 = vmul.f32 -1.442695, %v3411_v4  ;;  %v2552_v4 = vpop.permute.xlu0 %2551 }
 0x823   :  { %v2756_v47 = vmul.f32 -1.442695, %v3412_v8  ;;  %v2757_v46 = vmul.f32 -1.442695, %v3428_v3  ;;  %v2367_v9 = vunpack.c.0.s8 %v2366_v6  ;;  %vm2566_vm13 = vcmp.eq.s32.totalorder %v2552_v4, 1 }
 0x824   :  { %3579 = vpow2.f32 %v2755_v54 }
 0x825   :  { %3581 = vpow2.f32 %v2756_v47  ;;  %v2370_v58 = vsub.s32 %v2367_v9, %v4096_v25 }
 0x826   :  { %3583 = vpow2.f32 %v2757_v46  ;;  %v2558_v40 = vpop.permute.xlu0 %2557 }
 0x827   :  { %3585 = vtanh.f32 %v3427_v5  ;;  %v2378_v25 = vrot.slane %v2364_v27, %v2370_v58  ;;  %v2387_v20 = vrot.slane %v2379_v28, %v2370_v58  ;;  %v2394_v45 = vrot.slane %v2380_v42, %v2370_v58  ;;  %v2758_v28 = vld [vmem:[%s4892_s6] ss:$0 sm:$0xff] }
 0x828   :  { %vm2568_vm15 = vcmp.eq.s32.totalorder %v2558_v40, 1 }
 0x82e   :  { %v3580_v23 = vpop.eup %3579 }
 0x82f   :  { %v3582_v48 = vpop.eup %3581  ;;  %v2266_v56 = vadd.f32 1.0, %v3580_v23 }
 0x830   :  { %v2272_v30 = vadd.f32 1.0, %v3582_v48  ;;  %v3584_v33 = vpop.eup %3583 }
 0x831   :  { %3587 = vrcp.f32 %v2266_v56  ;;  %v3586_v50 = vpop.eup %3585  ;;  %v2279_v16 = vadd.f32 1.0, %v3584_v33 }
 0x832   :  { %3589 = vrcp.f32 %v2272_v30 }
 0x833   :  { %3591 = vrcp.f32 %v2279_v16 }
 0x83b   :  { %v3588_v34 = vpop.eup %3587 }
 0x83c   :  { %v3590_v1 = vpop.eup %3589  ;;  %v2283_v0 = vmul.f32 %v3588_v34, %v3586_v50 }
 0x83d   :  { %v2282_v53 = vmul.f32 %v3590_v1, %v4775_v21  ;;  %v3592_v12 = vpop.eup %3591 }
 0x83f   :  { %v2284_v15 = vadd.f32 %v2283_v0, %v2282_v53 }
 0x841   :  { %3593 = vtanh.f32 %v2284_v15 }
 0x84b   :  { %v3594_v57 = vpop.eup %3593 }
 0x84c   :  { %v2286_v37 = vmul.f32 %v3594_v57, %v3592_v12 }
 0x84e   :  { %v2347_v51 = vcombine.low %v4633_v41, %v2286_v37  ;;  %v2348_v21 = vcombine.high %v4633_v41, %v2286_v37  ;;  %v2371_v41 = vrot.slane %v2363_v63, %v2370_v58 }
 0x850   :  { %v2355_v17 = vrot.slane %v2347_v51, %v4520_v11  ;;  %v2362_v14 = vrot.slane %v2348_v21, %v4520_v11  ;;  %v2549_v11 = vpop.permute.xlu1 %2548 }
 0x851   :  { %vm2565_vm12 = vcmp.eq.s32.totalorder %v2549_v11, 1 }
 0x852   :  { %v2395_v35 = vcombine.low %v2339_v2, %v2355_v17  ;;  %v2396_v39 = vcombine.high %v2339_v2, %v2355_v17  ;;  %v2411_v32 = vcombine.low %v2346_v7, %v2362_v14  ;;  %v2412_v59 = vcombine.high %v2346_v7, %v2362_v14 }
 0x854   :  { %v2403_v49 = vrot.slane %v2395_v35, %v2370_v58  ;;  %v2410_v55 = vrot.slane %v2396_v39, %v2370_v58  ;;  %v2419_v61 = vrot.slane %v2411_v32, %v2370_v58  ;;  %v2426_v13 = vrot.slane %v2412_v59, %v2370_v58  ;;  %v2555_v26 = vpop.permute.xlu1 %2554 }
 0x855   :  { %vm2567_vm14 = vcmp.eq.s32.totalorder %v2555_v26, 1 }
 0x856   :  { %v2427_v63 = vcombine.low %v2371_v41, %v2403_v49  ;;  %v2428_v22 = vcombine.high %v2371_v41, %v2403_v49  ;;  %v2429_v29 = vcombine.low %v2378_v25, %v2410_v55  ;;  %v2430_v18 = vcombine.high %v2378_v25, %v2410_v55 }
 0x857   :  { %v2431_v31 = vcombine.low %v2387_v20, %v2419_v61  ;;  %v2432_v27 = vcombine.high %v2387_v20, %v2419_v61  ;;  %v2433_v10 = vcombine.low %v2394_v45, %v2426_v13  ;;  %v2434_v36 = vcombine.high %v2394_v45, %v2426_v13 }
 0x858   :  { %2823 = vmatprep.mubr.msk.f32.mxu0 %vm2562_vm9, %v2427_v63  ;;  %v2561_v38 = vpop.permute.xlu1 %2560 }
 0x859   :  { %2824 = vmatmul.mubr.msk.f32.vlgmr.msra.gmra.mrb[16].mxu0 %vm2563_vm11, %v2428_v22  ;;  %vm2569_vm0 = vcmp.eq.s32.totalorder %v2561_v38, 1 }
 0x85a   :  { %2826 = vmatprep.mubr.msk.f32.mxu0 %vm2564_vm10, %v2429_v29 }
 0x85d   :  { %2827 = vmatmul.mubr.msk.f32.gmra.mrb[18].mxu0 %vm2565_vm12, %v2430_v18 }
 0x85e   :  { %2829 = vmatprep.mubr.msk.f32.mxu0 %vm2566_vm13, %v2431_v31 }
 0x861   :  { %2830 = vmatmul.mubr.msk.f32.gmra.mrb[20].mxu0 %vm2567_vm14, %v2432_v27 }
 0x862   :  { %2832 = vmatprep.mubr.msk.f32.mxu0 %vm2568_vm15, %v2433_v10 }
 0x865   :  { %2833 = vmatmul.mubr.msk.f32.gmra.mrb[22].mxu0 %vm2569_vm0, %v2434_v36 }
 0x92c   :  { %v2825_v42 = vpop.f32.mrb[16].mxu0 }
 0x92d   :  { %v2673_v24 = vadd.f32 %v2825_v42, %v2758_v28  ;;  %v2667_v8 = vpop.f32.mrb[17].mxu0 }
 0x92e   :  { %v2668_v54 = vadd.f32 %v2758_v28, %v2667_v8 }
 0x92f   :  { %2707 = vst [vmem:[%s4893_s7 + $0x8] sm:$0xff] %v2673_v24 }
 0x930   :  { %2706 = vst [vmem:[%s4893_s7] sm:$0xff] %v2668_v54  ;;  %v2828_v47 = vpop.f32.mrb[18].mxu0 }
 0x931   :  { %v2683_v3 = vadd.f32 %v2828_v47, %v2758_v28  ;;  %v2677_v46 = vpop.f32.mrb[19].mxu0 }
 0x932   :  { %v2678_v5 = vadd.f32 %v2758_v28, %v2677_v46 }
 0x933   :  { %2709 = vst [vmem:[%s4893_s7 + $0x18] sm:$0xff] %v2683_v3 }
 0x934   :  { %2708 = vst [vmem:[%s4893_s7 + $0x10] sm:$0xff] %v2678_v5  ;;  %v2831_v23 = vpop.f32.mrb[20].mxu0 }
 0x935   :  { %v2693_v48 = vadd.f32 %v2831_v23, %v2758_v28  ;;  %v2687_v56 = vpop.f32.mrb[21].mxu0 }
 0x936   :  { %v2688_v30 = vadd.f32 %v2758_v28, %v2687_v56 }
 0x937   :  { %2711 = vst [vmem:[%s4893_s7 + $0x28] sm:$0xff] %v2693_v48 }
 0x938   :  { %2710 = vst [vmem:[%s4893_s7 + $0x20] sm:$0xff] %v2688_v30  ;;  %v2834_v33 = vpop.f32.mrb[22].mxu0 }
 0x939   :  { %v2703_v50 = vadd.f32 %v2834_v33, %v2758_v28  ;;  %v2697_v34 = vpop.f32.mrb[23].mxu0 }
 0x93a   :  { %v2698_v1 = vadd.f32 %v2758_v28, %v2697_v34 }
 0x93b   :  { %2713 = vst [vmem:[%s4893_s7 + $0x38] sm:$0xff] %v2703_v50 }
 0x93c   :  { %2712 = vst [vmem:[%s4893_s7 + $0x30] sm:$0xff] %v2698_v1 }

</bundles_post_ra>
